<compile_context>
chip_gen: v7x
topology: tpu7x:2x2x1
jax: 0.10.0
libtpu: 0.0.40
codegen_flags: <defaults>
</compile_context>

<pallas_src>
import functools
import numpy as np
import jax
import jax.numpy as jnp
from jax.experimental import pallas as pl
from jax.experimental.pallas import tpu as pltpu


# ----------------------------- fused Pallas kernel -----------------------------

def _fused_denoiser_kernel(x_ref, w1_ref, b1_ref, w2_ref, b2_ref, o_ref,
                           p1_ref, p2_ref, *, H, W, C, Hd, L, scale, c1, c2):
    """Fully fused denoiser step for one lane-block of images.

    Lane-dense layout (channels in sublanes, batch*spatial in lanes):
      x_ref  : (C, L)     f32   L = images_per_block * H * W
      w1_ref : (Hd, 9*C)  bf16  conv1 weight (transposed, tap-major columns)
      b1_ref : (Hd, 1)    f32   conv1 bias + fixed-t timestep embedding
      w2_ref : (C, 9*Hd)  bf16  conv2 weight, eps half of learn_sigma (transposed)
      b2_ref : (C, 1)     f32   conv2 bias, eps half
      o_ref  : (C, L)     f32
      p1_ref : (9*C, L)   bf16  VMEM scratch: tap-concatenated conv1 patches
      p2_ref : (9*Hd, L)  bf16  VMEM scratch: tap-concatenated conv2 patches
    """
    shift_w = W.bit_length() - 1          # W, H are powers of two (asserted in wrapper)

    # ---- fused prescale: x_t = sqrt(alpha_bar_t) * (2*x - 1)   (f32, lane-dense) ----
    xt = (2.0 * scale) * x_ref[...] - scale

    def shift_lanes(v, off):
        # out[:, p] = v[:, (p + off) % L]  (static off; lowers to XLU lane rotation)
        s = off % L
        if s == 0:
            return v
        return jnp.concatenate([v[:, s:], v[:, :s]], axis=1)

    def stage_patches(src, p_ref, rows):
        # Build the tap-concatenated (9*rows, L) bf16 patch matrix in VMEM so the
        # 3x3 conv becomes ONE MXU matmul instead of 9 small-K ones.  Image
        # boundaries (and cross-image wrap when several images share the lane
        # axis) are zeroed with in-kernel iota masks -- no halo scratch, no
        # mask input, no full-scratch zeroing.
        lane = jax.lax.broadcasted_iota(jnp.int32, (rows, L), 1)
        w_id = lane & (W - 1)                    # lane % W
        h_id = (lane >> shift_w) & (H - 1)       # (lane // W) % H
        row_ok = {-1: h_id >= 1, 1: h_id <= H - 2}
        col_ok = {-1: w_id >= 1, 1: w_id <= W - 2}
        t = 0
        for dh in (-1, 0, 1):
            for dw in (-1, 0, 1):
                v = shift_lanes(src, dh * W + dw)
                m = None
                if dh != 0:
                    m = row_ok[dh]
                if dw != 0:
                    m = col_ok[dw] if m is None else jnp.logical_and(m, col_ok[dw])
                if m is not None:
                    v = jnp.where(m, v, 0.0)
                # cast exactly once per element, straight into the bf16 scratch
                p_ref[pl.ds(t * rows, rows), :] = v.astype(p_ref.dtype)
                t += 1

    # ---- conv1: 3x3 (C -> Hd) as a single (Hd,9C)@(9C,L) matmul, +bias(+emb), SiLU ----
    stage_patches(xt, p1_ref, C)
    h = jnp.dot(w1_ref[...], p1_ref[...], preferred_element_type=jnp.float32)
    h = h + b1_ref[...]
    h = h * jax.nn.sigmoid(h)                    # SiLU (EUP), f32, lane-dense

    # ---- conv2 (eps half only): 3x3 (Hd -> C) as a single (C,9Hd)@(9Hd,L) matmul ----
    stage_patches(h, p2_ref, Hd)
    eps = jnp.dot(w2_ref[...], p2_ref[...], preferred_element_type=jnp.float32)
    eps = eps + b2_ref[...]

    # ---- fused post: pred_xstart = clip(c1*x_t - c2*eps, -1, 1); out = (p+1)/2 ----
    pred = jnp.clip(c1 * xt - c2 * eps, -1.0, 1.0)
    o_ref[...] = ((pred + 1.0) * 0.5).astype(o_ref.dtype)


def fused_denoiser(x_cm, w1t, b1t, w2t, b2t, *, N, H, W, C, Hd,
                   scale, c1, c2, images_per_block=None):
    """x_cm: (C, N*H*W) channel-major, image-major lanes.  Returns (C, N*H*W)."""
    HW = H * W
    assert x_cm.shape == (C, N * HW)
    # power-of-two spatial dims let the in-kernel masks use shifts/ANDs
    assert (H & (H - 1)) == 0 and (W & (W - 1)) == 0, "H, W must be powers of two"

    if images_per_block is None:
        # >=2 grid steps when possible (v7x 2-TC sharding), several images per
        # step otherwise (amortizes per-step overhead on single-TC v5e/v6e).
        images_per_block = N // 2 if (N >= 2 and N % 2 == 0) else 1
    assert N % images_per_block == 0
    L = images_per_block * HW
    nsteps = N // images_per_block
    assert (L % 128 == 0) or nsteps == 1, "lane block must be a multiple of 128"

    kernel = functools.partial(_fused_denoiser_kernel, H=H, W=W, C=C, Hd=Hd, L=L,
                               scale=float(scale), c1=float(c1), c2=float(c2))

    flops = 2 * N * HW * (9 * C * Hd + 9 * Hd * C)       # the two fused conv matmuls
    bytes_accessed = 2 * N * HW * C * 4 + (w1t.size + w2t.size) * 2 \
                     + (b1t.size + b2t.size) * 4
    cost = pl.CostEstimate(flops=int(flops),
                           transcendentals=int(N * HW * Hd),
                           bytes_accessed=int(bytes_accessed))

    return pl.pallas_call(
        kernel,
        out_shape=jax.ShapeDtypeStruct((C, N * HW), jnp.float32),
        grid=(nsteps,),
        in_specs=[
            pl.BlockSpec((C, L), lambda i: (0, i)),          # x (lane-dense block)
            pl.BlockSpec((Hd, 9 * C), lambda i: (0, 0)),     # conv1 weight (resident)
            pl.BlockSpec((Hd, 1), lambda i: (0, 0)),         # conv1 bias + emb
            pl.BlockSpec((C, 9 * Hd), lambda i: (0, 0)),     # conv2 weight, eps half
            pl.BlockSpec((C, 1), lambda i: (0, 0)),          # conv2 bias, eps half
        ],
        out_specs=pl.BlockSpec((C, L), lambda i: (0, i)),
        scratch_shapes=[
            pltpu.VMEM((9 * C, L), jnp.bfloat16),            # conv1 patches (bf16)
            pltpu.VMEM((9 * Hd, L), jnp.bfloat16),           # conv2 patches (bf16)
        ],
        compiler_params=pltpu.CompilerParams(
            dimension_semantics=("parallel",),               # images across v7x's 2 TCs
            vmem_limit_bytes=32 * 1024 * 1024,
        ),
        cost_estimate=cost,
    )(x_cm, w1t, b1t, w2t, b2t)


# ----------------------------- JAX glue -----------------------------

def sinusoidal_embedding(t, dim):
    half = dim // 2
    freqs = np.exp(-np.log(10000.0) * np.arange(half, dtype=np.float64) / half)
    args = float(t) * freqs
    return jnp.asarray(np.concatenate([np.cos(args), np.sin(args)]), dtype=jnp.float32)


# ----------------------------- Module -----------------------------

class ImagenetGDMPallas:
    """JAX/Pallas re-implementation of imagenet_gdm.forward with a synthetic denoiser."""

    def __init__(self, sigma, in_ch=4, hidden=32, num_timesteps=1000, seed=0):
        self.in_ch = in_ch
        self.hidden = hidden
        self.sigma = float(sigma)

        # ---- linear diffusion schedule (guided_diffusion defaults) ----
        scale = 1000.0 / num_timesteps
        betas = np.linspace(scale * 0.0001, scale * 0.02, num_timesteps, dtype=np.float64)
        alphas_cumprod = np.cumprod(1.0 - betas)
        self.sqrt_alphas_cumprod = np.sqrt(alphas_cumprod)
        self.sqrt_one_minus_alphas_cumprod = np.sqrt(1.0 - alphas_cumprod)
        self.sqrt_recip_alphas_cumprod = np.sqrt(1.0 / alphas_cumprod)
        self.sqrt_recipm1_alphas_cumprod = np.sqrt(1.0 / alphas_cumprod - 1.0)

        self.t = self._get_t(self.sigma)
        self.sqrt_alpha_t = float(self.sqrt_alphas_cumprod[self.t])
        self.c1 = float(self.sqrt_recip_alphas_cumprod[self.t])
        self.c2 = float(self.sqrt_recipm1_alphas_cumprod[self.t])

        # ---- deterministic synthetic denoiser parameters ----
        # TODO(synk): stand-in conv denoiser; the full pretrained 256x256 UNet
        # (res blocks, attention, checkpoint weights) is not reproducible in-script.
        keys = jax.random.split(jax.random.PRNGKey(seed), 6)
        C, Hd = in_ch, hidden
        self.w1 = 0.1 * jax.random.normal(keys[0], (9 * C, Hd), jnp.float32)
        self.b1 = 0.01 * jax.random.normal(keys[1], (1, Hd), jnp.float32)
        self.w2 = 0.1 * jax.random.normal(keys[2], (9 * Hd, 2 * C), jnp.float32)  # learn_sigma
        self.b2 = 0.01 * jax.random.normal(keys[3], (1, 2 * C), jnp.float32)
        self.we1 = 0.1 * jax.random.normal(keys[4], (Hd, Hd), jnp.float32)
        self.we2 = 0.1 * jax.random.normal(keys[5], (Hd, Hd), jnp.float32)

        # Fold the (fixed-t) timestep embedding into the conv1 bias once.
        emb = self._timestep_emb()
        self.b1_eff = self.b1 + emb

        # Transposed, bf16 MXU weights for the lane-dense kernel layout; only the
        # eps half of the 2*C learn_sigma output is ever used for pred_xstart.
        self.w1t_bf16 = jnp.asarray(self.w1.T, dtype=jnp.bfloat16)              # (Hd, 9C)
        self.b1t_eff = jnp.asarray(self.b1_eff.T)                                # (Hd, 1)
        self.w2t_eps_bf16 = jnp.asarray(self.w2[:, :C].T, dtype=jnp.bfloat16)    # (C, 9Hd)
        self.b2t_eps = jnp.asarray(self.b2[:, :C].T)                             # (C, 1)

    def _get_t(self, sigma):
        ratio = self.sqrt_one_minus_alphas_cumprod / self.sqrt_alphas_cumprod
        for i in range(len(ratio)):
            if ratio[i] >= 2 * sigma:
                return i
        return len(ratio) - 1

    def _timestep_emb(self):
        e = sinusoidal_embedding(self.t, self.hidden)
        e = jax.nn.silu(e @ self.we1)
        return (e @ self.we2).reshape(1, self.hidden)

    def __call__(self, x_nchw):
        # external layout: NCHW (PyTorch); kernel layout: channel-major (C, N*H*W)
        # so spatial+batch sit in lanes (lane-dense) -- layout plumbing in the wrapper.
        N, C, H, W = x_nchw.shape
        assert C == self.in_ch
        x_cm = jnp.transpose(x_nchw, (1, 0, 2, 3)).reshape(C, N * H * W).astype(jnp.float32)

        out_cm = fused_denoiser(
            x_cm, self.w1t_bf16, self.b1t_eff, self.w2t_eps_bf16, self.b2t_eps,
            N=N, H=H, W=W, C=C, Hd=self.hidden,
            scale=self.sqrt_alpha_t, c1=self.c1, c2=self.c2)
        return jnp.transpose(out_cm.reshape(C, N, H, W), (1, 0, 2, 3))

    # pure-JAX reference (f32) for correctness validation
    def reference(self, x_nchw):
        N, C, H, W = x_nchw.shape
        x = jnp.transpose(x_nchw, (0, 2, 3, 1)).astype(jnp.float32)
        xt = self.sqrt_alpha_t * (2.0 * x - 1.0)

        def conv3x3(a, w, b):
            n, h, wd, cin = a.shape
            ap = jnp.pad(a, ((0, 0), (1, 1), (1, 1), (0, 0)))
            pats = jnp.concatenate([ap[:, i:i + h, j:j + wd, :]
                                    for i in range(3) for j in range(3)], axis=-1)
            return pats.reshape(n * h * wd, 9 * cin) @ w + b

        h1 = conv3x3(xt, self.w1, self.b1_eff)
        h1 = h1 * jax.nn.sigmoid(h1)
        eps = conv3x3(h1.reshape(N, H, W, self.hidden), self.w2[:, :C], self.b2[:, :C])
        pred = jnp.clip(self.c1 * xt.reshape(N * H * W, C) - self.c2 * eps, -1.0, 1.0)
        out = (pred + 1.0) * 0.5
        return jnp.transpose(out.reshape(N, H, W, C), (0, 3, 1, 2))


# ----------------------------- main -----------------------------

if __name__ == "__main__":
    key = jax.random.PRNGKey(0)
    batch, channels, spatial = 2, 4, 16
    x = jax.random.uniform(key, (batch, channels, spatial, spatial), jnp.float32)

    model = ImagenetGDMPallas(sigma=0.05, in_ch=channels, hidden=32)
    out = jax.block_until_ready(model(x))

    assert out.shape == (batch, channels, spatial, spatial)
    assert bool(jnp.all(jnp.isfinite(out)))
    assert bool(jnp.all(out >= 0.0)) and bool(jnp.all(out <= 1.0))

    # validate the fused lane-dense kernel against the pure-JAX f32 reference
    ref = model.reference(x)
    err = float(jnp.max(jnp.abs(out - ref)))
    assert err < 2e-2, f"kernel/reference mismatch: max abs err = {err}"

    print("KERNEL_OK")
</pallas_src>

<mosaic_0001>
module attributes {stable_mosaic.version = 11 : i64} {
  func.func @_fused_denoiser_kernel(%arg0: i32, %arg1: memref<4x256xf32, #tpu.memory_space<vmem>>, %arg2: memref<32x36xbf16, #tpu.memory_space<vmem>>, %arg3: memref<32x1xf32, #tpu.memory_space<vmem>>, %arg4: memref<4x288xbf16, #tpu.memory_space<vmem>>, %arg5: memref<4x1xf32, #tpu.memory_space<vmem>>, %arg6: memref<4x256xf32, #tpu.memory_space<vmem>>, %arg7: memref<36x256xbf16, #tpu.memory_space<vmem>>, %arg8: memref<288x256xbf16, #tpu.memory_space<vmem>>) attributes {dimension_semantics = [#tpu.dimension_semantics<parallel>], iteration_bounds = array<i64: 2>, scalar_prefetch = 0 : i64, scratch_operands = 2 : i64, tpu.core_type = #tpu.core_type<tc>, window_params = [{transform_indices = @transform_0, window_bounds = array<i64: 4, 256>}, {pipeline_mode = #tpu.pipeline_mode<synchronous>, transform_indices = @transform_1, window_bounds = array<i64: 32, 36>}, {pipeline_mode = #tpu.pipeline_mode<synchronous>, transform_indices = @transform_2, window_bounds = array<i64: 32, 1>}, {pipeline_mode = #tpu.pipeline_mode<synchronous>, transform_indices = @transform_3, window_bounds = array<i64: 4, 288>}, {pipeline_mode = #tpu.pipeline_mode<synchronous>, transform_indices = @transform_4, window_bounds = array<i64: 4, 1>}, {transform_indices = @transform_5, window_bounds = array<i64: 4, 256>}]} {
    %c0 = arith.constant 0 : index
    %c0_0 = arith.constant 0 : index
    %0 = vector.load %arg1[%c0, %c0_0] : memref<4x256xf32, #tpu.memory_space<vmem>>, vector<4x256xf32>
    %cst = arith.constant 1.9896946 : f32
    %1 = vector.broadcast %cst : f32 to vector<4x256xf32>
    %2 = arith.mulf %1, %0 : vector<4x256xf32>
    %cst_1 = arith.constant 0.994847297 : f32
    %3 = vector.broadcast %cst_1 : f32 to vector<4x256xf32>
    %4 = arith.subf %2, %3 : vector<4x256xf32>
    %5 = tpu.iota {dimensions = array<i32: 1>} : vector<4x256xi32>
    %c15_i32 = arith.constant 15 : i32
    %6 = vector.broadcast %c15_i32 : i32 to vector<4x256xi32>
    %7 = arith.andi %5, %6 : vector<4x256xi32>
    %c4_i32 = arith.constant 4 : i32
    %8 = vector.broadcast %c4_i32 : i32 to vector<4x256xi32>
    %9 = arith.shrsi %5, %8 : vector<4x256xi32>
    %c15_i32_2 = arith.constant 15 : i32
    %10 = vector.broadcast %c15_i32_2 : i32 to vector<4x256xi32>
    %11 = arith.andi %9, %10 : vector<4x256xi32>
    %c1_i32 = arith.constant 1 : i32
    %12 = vector.broadcast %c1_i32 : i32 to vector<4x256xi32>
    %13 = arith.cmpi sge, %11, %12 : vector<4x256xi32>
    %c14_i32 = arith.constant 14 : i32
    %14 = vector.broadcast %c14_i32 : i32 to vector<4x256xi32>
    %15 = arith.cmpi sle, %11, %14 : vector<4x256xi32>
    %c1_i32_3 = arith.constant 1 : i32
    %16 = vector.broadcast %c1_i32_3 : i32 to vector<4x256xi32>
    %17 = arith.cmpi sge, %7, %16 : vector<4x256xi32>
    %c14_i32_4 = arith.constant 14 : i32
    %18 = vector.broadcast %c14_i32_4 : i32 to vector<4x256xi32>
    %19 = arith.cmpi sle, %7, %18 : vector<4x256xi32>
    %20 = vector.extract_strided_slice %4 {offsets = [0, 239], sizes = [4, 17], strides = [1, 1]} : vector<4x256xf32> to vector<4x17xf32>
    %21 = vector.extract_strided_slice %4 {offsets = [0, 0], sizes = [4, 239], strides = [1, 1]} : vector<4x256xf32> to vector<4x239xf32>
    %22 = tpu.concatenate %20, %21 in 1 : vector<4x17xf32>, vector<4x239xf32> -> vector<4x256xf32>
    %23 = arith.andi %13, %17 : vector<4x256xi1>
    %cst_5 = arith.constant 0.000000e+00 : f32
    %24 = vector.broadcast %cst_5 : f32 to vector<4x256xf32>
    %25 = arith.select %23, %22, %24 : vector<4x256xi1>, vector<4x256xf32>
    %26 = arith.truncf %25 : vector<4x256xf32> to vector<4x256xbf16>
    %c0_6 = arith.constant 0 : index
    %c0_7 = arith.constant 0 : index
    %27 = vector.load %arg7[%c0_6, %c0_7] : memref<36x256xbf16, #tpu.memory_space<vmem>>, vector<4x256xbf16>
    tpu.vector_store %arg7[%c0_6, %c0_7], %26 {strides = array<i32>} : memref<36x256xbf16, #tpu.memory_space<vmem>>, vector<4x256xbf16>,
    %28 = vector.extract_strided_slice %4 {offsets = [0, 240], sizes = [4, 16], strides = [1, 1]} : vector<4x256xf32> to vector<4x16xf32>
    %29 = vector.extract_strided_slice %4 {offsets = [0, 0], sizes = [4, 240], strides = [1, 1]} : vector<4x256xf32> to vector<4x240xf32>
    %30 = tpu.concatenate %28, %29 in 1 : vector<4x16xf32>, vector<4x240xf32> -> vector<4x256xf32>
    %cst_8 = arith.constant 0.000000e+00 : f32
    %31 = vector.broadcast %cst_8 : f32 to vector<4x256xf32>
    %32 = arith.select %13, %30, %31 : vector<4x256xi1>, vector<4x256xf32>
    %33 = arith.truncf %32 : vector<4x256xf32> to vector<4x256xbf16>
    %c4 = arith.constant 4 : index
    %c0_9 = arith.constant 0 : index
    %34 = vector.load %arg7[%c4, %c0_9] : memref<36x256xbf16, #tpu.memory_space<vmem>>, vector<4x256xbf16>
    tpu.vector_store %arg7[%c4, %c0_9], %33 {strides = array<i32>} : memref<36x256xbf16, #tpu.memory_space<vmem>>, vector<4x256xbf16>,
    %35 = vector.extract_strided_slice %4 {offsets = [0, 241], sizes = [4, 15], strides = [1, 1]} : vector<4x256xf32> to vector<4x15xf32>
    %36 = vector.extract_strided_slice %4 {offsets = [0, 0], sizes = [4, 241], strides = [1, 1]} : vector<4x256xf32> to vector<4x241xf32>
    %37 = tpu.concatenate %35, %36 in 1 : vector<4x15xf32>, vector<4x241xf32> -> vector<4x256xf32>
    %38 = arith.andi %13, %19 : vector<4x256xi1>
    %cst_10 = arith.constant 0.000000e+00 : f32
    %39 = vector.broadcast %cst_10 : f32 to vector<4x256xf32>
    %40 = arith.select %38, %37, %39 : vector<4x256xi1>, vector<4x256xf32>
    %41 = arith.truncf %40 : vector<4x256xf32> to vector<4x256xbf16>
    %c8 = arith.constant 8 : index
    %c0_11 = arith.constant 0 : index
    %42 = vector.load %arg7[%c8, %c0_11] : memref<36x256xbf16, #tpu.memory_space<vmem>>, vector<4x256xbf16>
    tpu.vector_store %arg7[%c8, %c0_11], %41 {strides = array<i32>} : memref<36x256xbf16, #tpu.memory_space<vmem>>, vector<4x256xbf16>,
    %43 = vector.extract_strided_slice %4 {offsets = [0, 255], sizes = [4, 1], strides = [1, 1]} : vector<4x256xf32> to vector<4x1xf32>
    %44 = vector.extract_strided_slice %4 {offsets = [0, 0], sizes = [4, 255], strides = [1, 1]} : vector<4x256xf32> to vector<4x255xf32>
    %45 = tpu.concatenate %43, %44 in 1 : vector<4x1xf32>, vector<4x255xf32> -> vector<4x256xf32>
    %cst_12 = arith.constant 0.000000e+00 : f32
    %46 = vector.broadcast %cst_12 : f32 to vector<4x256xf32>
    %47 = arith.select %17, %45, %46 : vector<4x256xi1>, vector<4x256xf32>
    %48 = arith.truncf %47 : vector<4x256xf32> to vector<4x256xbf16>
    %c12 = arith.constant 12 : index
    %c0_13 = arith.constant 0 : index
    %49 = vector.load %arg7[%c12, %c0_13] : memref<36x256xbf16, #tpu.memory_space<vmem>>, vector<4x256xbf16>
    tpu.vector_store %arg7[%c12, %c0_13], %48 {strides = array<i32>} : memref<36x256xbf16, #tpu.memory_space<vmem>>, vector<4x256xbf16>,
    %50 = arith.truncf %4 : vector<4x256xf32> to vector<4x256xbf16>
    %c16 = arith.constant 16 : index
    %c0_14 = arith.constant 0 : index
    %51 = vector.load %arg7[%c16, %c0_14] : memref<36x256xbf16, #tpu.memory_space<vmem>>, vector<4x256xbf16>
    tpu.vector_store %arg7[%c16, %c0_14], %50 {strides = array<i32>} : memref<36x256xbf16, #tpu.memory_space<vmem>>, vector<4x256xbf16>,
    %52 = vector.extract_strided_slice %4 {offsets = [0, 1], sizes = [4, 255], strides = [1, 1]} : vector<4x256xf32> to vector<4x255xf32>
    %53 = vector.extract_strided_slice %4 {offsets = [0, 0], sizes = [4, 1], strides = [1, 1]} : vector<4x256xf32> to vector<4x1xf32>
    %54 = tpu.concatenate %52, %53 in 1 : vector<4x255xf32>, vector<4x1xf32> -> vector<4x256xf32>
    %cst_15 = arith.constant 0.000000e+00 : f32
    %55 = vector.broadcast %cst_15 : f32 to vector<4x256xf32>
    %56 = arith.select %19, %54, %55 : vector<4x256xi1>, vector<4x256xf32>
    %57 = arith.truncf %56 : vector<4x256xf32> to vector<4x256xbf16>
    %c20 = arith.constant 20 : index
    %c0_16 = arith.constant 0 : index
    %58 = vector.load %arg7[%c20, %c0_16] : memref<36x256xbf16, #tpu.memory_space<vmem>>, vector<4x256xbf16>
    tpu.vector_store %arg7[%c20, %c0_16], %57 {strides = array<i32>} : memref<36x256xbf16, #tpu.memory_space<vmem>>, vector<4x256xbf16>,
    %59 = vector.extract_strided_slice %4 {offsets = [0, 15], sizes = [4, 241], strides = [1, 1]} : vector<4x256xf32> to vector<4x241xf32>
    %60 = vector.extract_strided_slice %4 {offsets = [0, 0], sizes = [4, 15], strides = [1, 1]} : vector<4x256xf32> to vector<4x15xf32>
    %61 = tpu.concatenate %59, %60 in 1 : vector<4x241xf32>, vector<4x15xf32> -> vector<4x256xf32>
    %62 = arith.andi %15, %17 : vector<4x256xi1>
    %cst_17 = arith.constant 0.000000e+00 : f32
    %63 = vector.broadcast %cst_17 : f32 to vector<4x256xf32>
    %64 = arith.select %62, %61, %63 : vector<4x256xi1>, vector<4x256xf32>
    %65 = arith.truncf %64 : vector<4x256xf32> to vector<4x256xbf16>
    %c24 = arith.constant 24 : index
    %c0_18 = arith.constant 0 : index
    %66 = vector.load %arg7[%c24, %c0_18] : memref<36x256xbf16, #tpu.memory_space<vmem>>, vector<4x256xbf16>
    tpu.vector_store %arg7[%c24, %c0_18], %65 {strides = array<i32>} : memref<36x256xbf16, #tpu.memory_space<vmem>>, vector<4x256xbf16>,
    %67 = vector.extract_strided_slice %4 {offsets = [0, 16], sizes = [4, 240], strides = [1, 1]} : vector<4x256xf32> to vector<4x240xf32>
    %68 = vector.extract_strided_slice %4 {offsets = [0, 0], sizes = [4, 16], strides = [1, 1]} : vector<4x256xf32> to vector<4x16xf32>
    %69 = tpu.concatenate %67, %68 in 1 : vector<4x240xf32>, vector<4x16xf32> -> vector<4x256xf32>
    %cst_19 = arith.constant 0.000000e+00 : f32
    %70 = vector.broadcast %cst_19 : f32 to vector<4x256xf32>
    %71 = arith.select %15, %69, %70 : vector<4x256xi1>, vector<4x256xf32>
    %72 = arith.truncf %71 : vector<4x256xf32> to vector<4x256xbf16>
    %c28 = arith.constant 28 : index
    %c0_20 = arith.constant 0 : index
    %73 = vector.load %arg7[%c28, %c0_20] : memref<36x256xbf16, #tpu.memory_space<vmem>>, vector<4x256xbf16>
    tpu.vector_store %arg7[%c28, %c0_20], %72 {strides = array<i32>} : memref<36x256xbf16, #tpu.memory_space<vmem>>, vector<4x256xbf16>,
    %74 = vector.extract_strided_slice %4 {offsets = [0, 17], sizes = [4, 239], strides = [1, 1]} : vector<4x256xf32> to vector<4x239xf32>
    %75 = vector.extract_strided_slice %4 {offsets = [0, 0], sizes = [4, 17], strides = [1, 1]} : vector<4x256xf32> to vector<4x17xf32>
    %76 = tpu.concatenate %74, %75 in 1 : vector<4x239xf32>, vector<4x17xf32> -> vector<4x256xf32>
    %77 = arith.andi %15, %19 : vector<4x256xi1>
    %cst_21 = arith.constant 0.000000e+00 : f32
    %78 = vector.broadcast %cst_21 : f32 to vector<4x256xf32>
    %79 = arith.select %77, %76, %78 : vector<4x256xi1>, vector<4x256xf32>
    %80 = arith.truncf %79 : vector<4x256xf32> to vector<4x256xbf16>
    %c32 = arith.constant 32 : index
    %c0_22 = arith.constant 0 : index
    %81 = vector.load %arg7[%c32, %c0_22] : memref<36x256xbf16, #tpu.memory_space<vmem>>, vector<4x256xbf16>
    tpu.vector_store %arg7[%c32, %c0_22], %80 {strides = array<i32>} : memref<36x256xbf16, #tpu.memory_space<vmem>>, vector<4x256xbf16>,
    %c0_23 = arith.constant 0 : index
    %c0_24 = arith.constant 0 : index
    %82 = vector.load %arg2[%c0_23, %c0_24] : memref<32x36xbf16, #tpu.memory_space<vmem>>, vector<32x36xbf16>
    %c0_25 = arith.constant 0 : index
    %c0_26 = arith.constant 0 : index
    %83 = vector.load %arg7[%c0_25, %c0_26] : memref<36x256xbf16, #tpu.memory_space<vmem>>, vector<36x256xbf16>
    %cst_27 = arith.constant dense<0.000000e+00> : vector<32x256xf32>
    %84 = tpu.matmul %82, %83, %cst_27 {dimension_numbers = #tpu.dot_dimension_numbers<[1], [0], [0], [1], [0, 0, 1, 1], [], []>} : vector<32x36xbf16>, vector<36x256xbf16>, vector<32x256xf32> -> vector<32x256xf32>
    %c0_28 = arith.constant 0 : index
    %c0_29 = arith.constant 0 : index
    %85 = vector.load %arg3[%c0_28, %c0_29] : memref<32x1xf32, #tpu.memory_space<vmem>>, vector<32x1xf32>
    %86 = vector.broadcast %85 : vector<32x1xf32> to vector<32x256xf32>
    %87 = arith.addf %84, %86 : vector<32x256xf32>
    %88 = arith.negf %87 : vector<32x256xf32>
    %89 = math.exp %88 : vector<32x256xf32>
    %cst_30 = arith.constant 1.000000e+00 : f32
    %90 = vector.broadcast %cst_30 : f32 to vector<32x256xf32>
    %91 = arith.addf %90, %89 : vector<32x256xf32>
    %92 = arith.divf %90, %91 : vector<32x256xf32>
    %93 = arith.mulf %87, %92 : vector<32x256xf32>
    %94 = tpu.iota {dimensions = array<i32: 1>} : vector<32x256xi32>
    %c15_i32_31 = arith.constant 15 : i32
    %95 = vector.broadcast %c15_i32_31 : i32 to vector<32x256xi32>
    %96 = arith.andi %94, %95 : vector<32x256xi32>
    %c4_i32_32 = arith.constant 4 : i32
    %97 = vector.broadcast %c4_i32_32 : i32 to vector<32x256xi32>
    %98 = arith.shrsi %94, %97 : vector<32x256xi32>
    %c15_i32_33 = arith.constant 15 : i32
    %99 = vector.broadcast %c15_i32_33 : i32 to vector<32x256xi32>
    %100 = arith.andi %98, %99 : vector<32x256xi32>
    %c1_i32_34 = arith.constant 1 : i32
    %101 = vector.broadcast %c1_i32_34 : i32 to vector<32x256xi32>
    %102 = arith.cmpi sge, %100, %101 : vector<32x256xi32>
    %c14_i32_35 = arith.constant 14 : i32
    %103 = vector.broadcast %c14_i32_35 : i32 to vector<32x256xi32>
    %104 = arith.cmpi sle, %100, %103 : vector<32x256xi32>
    %c1_i32_36 = arith.constant 1 : i32
    %105 = vector.broadcast %c1_i32_36 : i32 to vector<32x256xi32>
    %106 = arith.cmpi sge, %96, %105 : vector<32x256xi32>
    %c14_i32_37 = arith.constant 14 : i32
    %107 = vector.broadcast %c14_i32_37 : i32 to vector<32x256xi32>
    %108 = arith.cmpi sle, %96, %107 : vector<32x256xi32>
    %109 = vector.extract_strided_slice %93 {offsets = [0, 239], sizes = [32, 17], strides = [1, 1]} : vector<32x256xf32> to vector<32x17xf32>
    %110 = vector.extract_strided_slice %93 {offsets = [0, 0], sizes = [32, 239], strides = [1, 1]} : vector<32x256xf32> to vector<32x239xf32>
    %111 = tpu.concatenate %109, %110 in 1 : vector<32x17xf32>, vector<32x239xf32> -> vector<32x256xf32>
    %112 = arith.andi %102, %106 : vector<32x256xi1>
    %cst_38 = arith.constant 0.000000e+00 : f32
    %113 = vector.broadcast %cst_38 : f32 to vector<32x256xf32>
    %114 = arith.select %112, %111, %113 : vector<32x256xi1>, vector<32x256xf32>
    %115 = arith.truncf %114 : vector<32x256xf32> to vector<32x256xbf16>
    %c0_39 = arith.constant 0 : index
    %c0_40 = arith.constant 0 : index
    %116 = vector.load %arg8[%c0_39, %c0_40] : memref<288x256xbf16, #tpu.memory_space<vmem>>, vector<32x256xbf16>
    tpu.vector_store %arg8[%c0_39, %c0_40], %115 {strides = array<i32>} : memref<288x256xbf16, #tpu.memory_space<vmem>>, vector<32x256xbf16>,
    %117 = vector.extract_strided_slice %93 {offsets = [0, 240], sizes = [32, 16], strides = [1, 1]} : vector<32x256xf32> to vector<32x16xf32>
    %118 = vector.extract_strided_slice %93 {offsets = [0, 0], sizes = [32, 240], strides = [1, 1]} : vector<32x256xf32> to vector<32x240xf32>
    %119 = tpu.concatenate %117, %118 in 1 : vector<32x16xf32>, vector<32x240xf32> -> vector<32x256xf32>
    %cst_41 = arith.constant 0.000000e+00 : f32
    %120 = vector.broadcast %cst_41 : f32 to vector<32x256xf32>
    %121 = arith.select %102, %119, %120 : vector<32x256xi1>, vector<32x256xf32>
    %122 = arith.truncf %121 : vector<32x256xf32> to vector<32x256xbf16>
    %c32_42 = arith.constant 32 : index
    %c0_43 = arith.constant 0 : index
    %123 = vector.load %arg8[%c32_42, %c0_43] : memref<288x256xbf16, #tpu.memory_space<vmem>>, vector<32x256xbf16>
    tpu.vector_store %arg8[%c32_42, %c0_43], %122 {strides = array<i32>} : memref<288x256xbf16, #tpu.memory_space<vmem>>, vector<32x256xbf16>,
    %124 = vector.extract_strided_slice %93 {offsets = [0, 241], sizes = [32, 15], strides = [1, 1]} : vector<32x256xf32> to vector<32x15xf32>
    %125 = vector.extract_strided_slice %93 {offsets = [0, 0], sizes = [32, 241], strides = [1, 1]} : vector<32x256xf32> to vector<32x241xf32>
    %126 = tpu.concatenate %124, %125 in 1 : vector<32x15xf32>, vector<32x241xf32> -> vector<32x256xf32>
    %127 = arith.andi %102, %108 : vector<32x256xi1>
    %cst_44 = arith.constant 0.000000e+00 : f32
    %128 = vector.broadcast %cst_44 : f32 to vector<32x256xf32>
    %129 = arith.select %127, %126, %128 : vector<32x256xi1>, vector<32x256xf32>
    %130 = arith.truncf %129 : vector<32x256xf32> to vector<32x256xbf16>
    %c64 = arith.constant 64 : index
    %c0_45 = arith.constant 0 : index
    %131 = vector.load %arg8[%c64, %c0_45] : memref<288x256xbf16, #tpu.memory_space<vmem>>, vector<32x256xbf16>
    tpu.vector_store %arg8[%c64, %c0_45], %130 {strides = array<i32>} : memref<288x256xbf16, #tpu.memory_space<vmem>>, vector<32x256xbf16>,
    %132 = vector.extract_strided_slice %93 {offsets = [0, 255], sizes = [32, 1], strides = [1, 1]} : vector<32x256xf32> to vector<32x1xf32>
    %133 = vector.extract_strided_slice %93 {offsets = [0, 0], sizes = [32, 255], strides = [1, 1]} : vector<32x256xf32> to vector<32x255xf32>
    %134 = tpu.concatenate %132, %133 in 1 : vector<32x1xf32>, vector<32x255xf32> -> vector<32x256xf32>
    %cst_46 = arith.constant 0.000000e+00 : f32
    %135 = vector.broadcast %cst_46 : f32 to vector<32x256xf32>
    %136 = arith.select %106, %134, %135 : vector<32x256xi1>, vector<32x256xf32>
    %137 = arith.truncf %136 : vector<32x256xf32> to vector<32x256xbf16>
    %c96 = arith.constant 96 : index
    %c0_47 = arith.constant 0 : index
    %138 = vector.load %arg8[%c96, %c0_47] : memref<288x256xbf16, #tpu.memory_space<vmem>>, vector<32x256xbf16>
    tpu.vector_store %arg8[%c96, %c0_47], %137 {strides = array<i32>} : memref<288x256xbf16, #tpu.memory_space<vmem>>, vector<32x256xbf16>,
    %139 = arith.truncf %93 : vector<32x256xf32> to vector<32x256xbf16>
    %c128 = arith.constant 128 : index
    %c0_48 = arith.constant 0 : index
    %140 = vector.load %arg8[%c128, %c0_48] : memref<288x256xbf16, #tpu.memory_space<vmem>>, vector<32x256xbf16>
    tpu.vector_store %arg8[%c128, %c0_48], %139 {strides = array<i32>} : memref<288x256xbf16, #tpu.memory_space<vmem>>, vector<32x256xbf16>,
    %141 = vector.extract_strided_slice %93 {offsets = [0, 1], sizes = [32, 255], strides = [1, 1]} : vector<32x256xf32> to vector<32x255xf32>
    %142 = vector.extract_strided_slice %93 {offsets = [0, 0], sizes = [32, 1], strides = [1, 1]} : vector<32x256xf32> to vector<32x1xf32>
    %143 = tpu.concatenate %141, %142 in 1 : vector<32x255xf32>, vector<32x1xf32> -> vector<32x256xf32>
    %cst_49 = arith.constant 0.000000e+00 : f32
    %144 = vector.broadcast %cst_49 : f32 to vector<32x256xf32>
    %145 = arith.select %108, %143, %144 : vector<32x256xi1>, vector<32x256xf32>
    %146 = arith.truncf %145 : vector<32x256xf32> to vector<32x256xbf16>
    %c160 = arith.constant 160 : index
    %c0_50 = arith.constant 0 : index
    %147 = vector.load %arg8[%c160, %c0_50] : memref<288x256xbf16, #tpu.memory_space<vmem>>, vector<32x256xbf16>
    tpu.vector_store %arg8[%c160, %c0_50], %146 {strides = array<i32>} : memref<288x256xbf16, #tpu.memory_space<vmem>>, vector<32x256xbf16>,
    %148 = vector.extract_strided_slice %93 {offsets = [0, 15], sizes = [32, 241], strides = [1, 1]} : vector<32x256xf32> to vector<32x241xf32>
    %149 = vector.extract_strided_slice %93 {offsets = [0, 0], sizes = [32, 15], strides = [1, 1]} : vector<32x256xf32> to vector<32x15xf32>
    %150 = tpu.concatenate %148, %149 in 1 : vector<32x241xf32>, vector<32x15xf32> -> vector<32x256xf32>
    %151 = arith.andi %104, %106 : vector<32x256xi1>
    %cst_51 = arith.constant 0.000000e+00 : f32
    %152 = vector.broadcast %cst_51 : f32 to vector<32x256xf32>
    %153 = arith.select %151, %150, %152 : vector<32x256xi1>, vector<32x256xf32>
    %154 = arith.truncf %153 : vector<32x256xf32> to vector<32x256xbf16>
    %c192 = arith.constant 192 : index
    %c0_52 = arith.constant 0 : index
    %155 = vector.load %arg8[%c192, %c0_52] : memref<288x256xbf16, #tpu.memory_space<vmem>>, vector<32x256xbf16>
    tpu.vector_store %arg8[%c192, %c0_52], %154 {strides = array<i32>} : memref<288x256xbf16, #tpu.memory_space<vmem>>, vector<32x256xbf16>,
    %156 = vector.extract_strided_slice %93 {offsets = [0, 16], sizes = [32, 240], strides = [1, 1]} : vector<32x256xf32> to vector<32x240xf32>
    %157 = vector.extract_strided_slice %93 {offsets = [0, 0], sizes = [32, 16], strides = [1, 1]} : vector<32x256xf32> to vector<32x16xf32>
    %158 = tpu.concatenate %156, %157 in 1 : vector<32x240xf32>, vector<32x16xf32> -> vector<32x256xf32>
    %cst_53 = arith.constant 0.000000e+00 : f32
    %159 = vector.broadcast %cst_53 : f32 to vector<32x256xf32>
    %160 = arith.select %104, %158, %159 : vector<32x256xi1>, vector<32x256xf32>
    %161 = arith.truncf %160 : vector<32x256xf32> to vector<32x256xbf16>
    %c224 = arith.constant 224 : index
    %c0_54 = arith.constant 0 : index
    %162 = vector.load %arg8[%c224, %c0_54] : memref<288x256xbf16, #tpu.memory_space<vmem>>, vector<32x256xbf16>
    tpu.vector_store %arg8[%c224, %c0_54], %161 {strides = array<i32>} : memref<288x256xbf16, #tpu.memory_space<vmem>>, vector<32x256xbf16>,
    %163 = vector.extract_strided_slice %93 {offsets = [0, 17], sizes = [32, 239], strides = [1, 1]} : vector<32x256xf32> to vector<32x239xf32>
    %164 = vector.extract_strided_slice %93 {offsets = [0, 0], sizes = [32, 17], strides = [1, 1]} : vector<32x256xf32> to vector<32x17xf32>
    %165 = tpu.concatenate %163, %164 in 1 : vector<32x239xf32>, vector<32x17xf32> -> vector<32x256xf32>
    %166 = arith.andi %104, %108 : vector<32x256xi1>
    %cst_55 = arith.constant 0.000000e+00 : f32
    %167 = vector.broadcast %cst_55 : f32 to vector<32x256xf32>
    %168 = arith.select %166, %165, %167 : vector<32x256xi1>, vector<32x256xf32>
    %169 = arith.truncf %168 : vector<32x256xf32> to vector<32x256xbf16>
    %c256 = arith.constant 256 : index
    %c0_56 = arith.constant 0 : index
    %170 = vector.load %arg8[%c256, %c0_56] : memref<288x256xbf16, #tpu.memory_space<vmem>>, vector<32x256xbf16>
    tpu.vector_store %arg8[%c256, %c0_56], %169 {strides = array<i32>} : memref<288x256xbf16, #tpu.memory_space<vmem>>, vector<32x256xbf16>,
    %c0_57 = arith.constant 0 : index
    %c0_58 = arith.constant 0 : index
    %171 = vector.load %arg4[%c0_57, %c0_58] : memref<4x288xbf16, #tpu.memory_space<vmem>>, vector<4x288xbf16>
    %c0_59 = arith.constant 0 : index
    %c0_60 = arith.constant 0 : index
    %172 = vector.load %arg8[%c0_59, %c0_60] : memref<288x256xbf16, #tpu.memory_space<vmem>>, vector<288x256xbf16>
    %cst_61 = arith.constant dense<0.000000e+00> : vector<4x256xf32>
    %173 = tpu.matmul %171, %172, %cst_61 {dimension_numbers = #tpu.dot_dimension_numbers<[1], [0], [0], [1], [0, 0, 1, 1], [], []>} : vector<4x288xbf16>, vector<288x256xbf16>, vector<4x256xf32> -> vector<4x256xf32>
    %c0_62 = arith.constant 0 : index
    %c0_63 = arith.constant 0 : index
    %174 = vector.load %arg5[%c0_62, %c0_63] : memref<4x1xf32, #tpu.memory_space<vmem>>, vector<4x1xf32>
    %175 = vector.broadcast %174 : vector<4x1xf32> to vector<4x256xf32>
    %176 = arith.addf %173, %175 : vector<4x256xf32>
    %cst_64 = arith.constant 1.00517941 : f32
    %177 = vector.broadcast %cst_64 : f32 to vector<4x256xf32>
    %178 = arith.mulf %177, %4 : vector<4x256xf32>
    %cst_65 = arith.constant 0.101909555 : f32
    %179 = vector.broadcast %cst_65 : f32 to vector<4x256xf32>
    %180 = arith.mulf %179, %176 : vector<4x256xf32>
    %181 = arith.subf %178, %180 : vector<4x256xf32>
    %cst_66 = arith.constant -1.000000e+00 : f32
    %cst_67 = arith.constant 1.000000e+00 : f32
    %182 = vector.broadcast %cst_66 : f32 to vector<4x256xf32>
    %183 = arith.maximumf %182, %181 : vector<4x256xf32>
    %184 = vector.broadcast %cst_67 : f32 to vector<4x256xf32>
    %185 = arith.minimumf %184, %183 : vector<4x256xf32>
    %cst_68 = arith.constant 1.000000e+00 : f32
    %186 = vector.broadcast %cst_68 : f32 to vector<4x256xf32>
    %187 = arith.addf %185, %186 : vector<4x256xf32>
    %cst_69 = arith.constant 5.000000e-01 : f32
    %188 = vector.broadcast %cst_69 : f32 to vector<4x256xf32>
    %189 = arith.mulf %187, %188 : vector<4x256xf32>
    %c0_70 = arith.constant 0 : index
    %c0_71 = arith.constant 0 : index
    %190 = vector.load %arg6[%c0_70, %c0_71] : memref<4x256xf32, #tpu.memory_space<vmem>>, vector<4x256xf32>
    tpu.vector_store %arg6[%c0_70, %c0_71], %189 {strides = array<i32>} : memref<4x256xf32, #tpu.memory_space<vmem>>, vector<4x256xf32>,
    return
  }
  func.func @transform_0(%arg0: i32) -> (i32, i32) {
    %c0_i32 = arith.constant 0 : i32
    %c0_i32_0 = arith.constant 0 : i32
    return %c0_i32, %arg0 : i32, i32
  }
  func.func @transform_1(%arg0: i32) -> (i32, i32) {
    %c0_i32 = arith.constant 0 : i32
    %c0_i32_0 = arith.constant 0 : i32
    %c0_i32_1 = arith.constant 0 : i32
    return %c0_i32, %c0_i32_0 : i32, i32
  }
  func.func @transform_2(%arg0: i32) -> (i32, i32) {
    %c0_i32 = arith.constant 0 : i32
    %c0_i32_0 = arith.constant 0 : i32
    %c0_i32_1 = arith.constant 0 : i32
    return %c0_i32, %c0_i32_0 : i32, i32
  }
  func.func @transform_3(%arg0: i32) -> (i32, i32) {
    %c0_i32 = arith.constant 0 : i32
    %c0_i32_0 = arith.constant 0 : i32
    %c0_i32_1 = arith.constant 0 : i32
    return %c0_i32, %c0_i32_0 : i32, i32
  }
  func.func @transform_4(%arg0: i32) -> (i32, i32) {
    %c0_i32 = arith.constant 0 : i32
    %c0_i32_0 = arith.constant 0 : i32
    %c0_i32_1 = arith.constant 0 : i32
    return %c0_i32, %c0_i32_0 : i32, i32
  }
  func.func @transform_5(%arg0: i32) -> (i32, i32) {
    %c0_i32 = arith.constant 0 : i32
    %c0_i32_0 = arith.constant 0 : i32
    return %c0_i32, %arg0 : i32, i32
  }
}

</mosaic_0001>

<bundles_post_ra>
// kernel: tpu_custom_call.1
= control target key start
LH: loop header
LB: loop body
LE: loop exit
PB: predicated region body
PF: predicated region fallthrough
CT: control target
= control target key end

     0   :  { %10 = vsyncpa [#allocation5], 0  ;;  %s2491_s0 = inlined_call_operand.vmem [shape: f32[4,512], index: 0, kind: input, shape index: {}]   ;;  %s2492_s1 = inlined_call_operand.vmem [shape: bf16[32,36], index: 1, kind: input, shape index: {}]   ;;  %s2493_s2 = inlined_call_operand.vmem [shape: f32[32,1], index: 2, kind: input, shape index: {}]   ;;  %s2494_s3 = inlined_call_operand.vmem [shape: bf16[4,288], index: 3, kind: input, shape index: {}]   ;;  %s2495_s4 = inlined_call_operand.vmem [shape: f32[4,1], index: 4, kind: input, shape index: {}]   ;;  %s2496_s5 = inlined_call_operand.hbm [shape: f32[4,512], index: 5, kind: output, shape index: {}]  }
   0x1   :  { %12 = vsyncpa [#allocation5 + $0x1], 0  ;;  %s1849_s18 = smov 0   ;;  %s1851_s19 = smov 0  }
   0x2   :  { %s1853_s20 = smov 0   ;;  %s1855_s21 = smov 0  }
   0x3 LB: > { %s1870_s22 = sadd.s32 4294967295, %s1806_s21   ;;  %s1297_s23 = sadd.s32 4294967294, %s1806_s21   ;;  %s1806_s21 = sphi %s1855_s21, %s2621_s21   ;;  %s1802_s20 = sphi %s1853_s20, %s2620_s20   ;;  %s1798_s19 = sphi %s1851_s19, %s2619_s19   ;;  %s1794_s18 = sphi %s1849_s18, %s2618_s18  }
   0x4   : > { %s1874_s24 = sadd.s32 1, %s1806_s21   ;;  %s135_s25 = sadd.s32 1, %s1802_s20 }
   0x5   : > { %s132_s26 = ssub.s32 %s1806_s21, %s1874_s24  ;;  %p145_p0 = scmp.ne.s32.totalorder %s1802_s20, %s1798_s19 }
   0x6   : > { %p133_p1 = scmp.eq.s32.totalorder %s132_s26, 0  ;;  %p146_p2 = scmp.eq.s32.totalorder %s1870_s22, 1 }
   0x7   : > { %p151_p3 = scmp.ne.s32.totalorder %s1798_s19, %s1794_s18  ;;  %p152_p4 = scmp.eq.s32.totalorder %s1297_s23, 1 }
   0x8   : > { %s1885_s27 = scalar_select %p133_p1, %s1802_s20, %s135_s25  }
   0x9   : > { %p1887_p5 = por %p146_p2, %p145_p0  ;;  %p1891_p6 = por %p152_p4, %p151_p3 }
   0xa   : > { %p1300_p7 = scmp.ge.s32.totalorder %s1806_s21, 1  ;;  %p191_p8 = scmp.lt.s32.totalorder %s1806_s21, 3 }
   0xc   : > { %p192_p9 = pnand %p1300_p7, %p191_p8 }
   0xd   : > { %s1302_s30 = sshll.u32 (!%p192_p9), %s1870_s22, 1  ;;  %s1808_s10 = smov (!%p192_p9), 16   ;;  %v1816_v7 = vmov (!%p192_p9), 0   ;;  %v448_v8 = vld [vmem:[%s2493_s2] sm:$0xff] (!%p192_p9)  ;;  %v449_v9 = vld [vmem:[%s2493_s2 + $0x8] sm:$0xff] (!%p192_p9)  ;;  %v450_v10 = vld [vmem:[%s2493_s2 + $0x10] sm:$0xff] (!%p192_p9)  ;;  %v230_v12 = vlaneseq (!%p192_p9) }
   0xe   : > { %195 = sbr.rel (%p192_p9) target bundleno = 868 (0x364), region = 40  ;;  %p220_p10 = scmp.lt.s32.totalorder (!%p192_p9), %s1302_s30, 3  ;;  %553 = vmatprep.mubr.bf16.mxu0 (!%p192_p9), %v1816_v7  ;;  %1539 = vset.pattern.permute.xlu0 (!%p192_p9), %v1816_v7  ;;  %v451_v11 = vld [vmem:[%s2493_s2 + $0x18] sm:$0xff] (!%p192_p9)  ;;  %vm2497_vm4 = vcmask (!%p192_p9), 130048   ;;  %vm2504_vm5 = vcmask (!%p192_p9), 138240   ;;  %vm2499_vm7 = vcmask (!%p192_p9), 7168  }
   0xf   : > { %s1809_s11 = smov (!%p192_p9), 17   ;;  %s1810_s12 = smov (!%p192_p9), 1   ;;  %1540 = vset.pattern.permute.xlu1 (!%p192_p9), %v1816_v7  ;;  %v231_v13 = vand.u32 (!%p192_p9), 127, %v230_v12  ;;  %vm2501_vm11 = vcmask (!%p192_p9), 121856   ;;  %vm2503_vm12 = vcmask (!%p192_p9), 1039360  }
  0x10   : > { %s1811_s13 = smov (!%p192_p9), 15   ;;  %s1812_s14 = smov (!%p192_p9), 127  }
  0x11   : > { %s1813_s15 = smov (!%p192_p9), 112   ;;  %s1814_s16 = smov (!%p192_p9), 113   ;;  %v232_v14 = vadd.s32 (!%p192_p9), 128, %v231_v13  ;;  %v235_v15 = vshra.s32 (!%p192_p9), %v231_v13, 4  ;;  %v233_v18 = vand.u32 (!%p192_p9), 15, %v231_v13 }
  0x12   : > { %s1815_s17 = smov (!%p192_p9), 111  }
  0x13   : > { %v236_v16 = vshra.s32 (!%p192_p9), %v232_v14, 4  ;;  %v1932_v17 = vand.u32 (!%p192_p9), 15, %v235_v15  ;;  %v234_v20 = vand.u32 (!%p192_p9), 15, %v232_v14  ;;  %vm1937_vm1 = vcmp.ge.s32.totalorder (!%p192_p9), %v233_v18, 1 }
  0x14   : > { %vm1962_vm9 = vcmp.le.s32.totalorder (!%p192_p9), %v233_v18, 14 }
  0x15   : > { %s2623_s30 = smov (!%p220_p10, %s1302_s30), 3  ;;  %v1934_v19 = vand.u32 15, %v236_v16  ;;  %vm2498_vm0 = vcmp.ge.s32.totalorder %v1932_v17, 1  ;;  %vm1942_vm3 = vcmp.ge.s32.totalorder %v234_v20, 1  ;;  %vm1966_vm10 = vcmp.le.s32.totalorder %v234_v20, 14 }
  0x16   : > { %s1303_s6 = sshll.u32 %s2623_s30, 2  ;;  %vm1950_vm6 = vmand %vm2498_vm0, %vm1937_vm1  ;;  %vm2505_vm15 = vcmp.le.s32.totalorder %v1932_v17, 14 }
  0x17   : > { %s223_s9 = scalar_lea.vmem %s2491_s0, %s1303_s6  ;;  %vm2500_vm2 = vcmp.ge.s32.totalorder %v1934_v19, 1  ;;  %vm1986_vm13 = vmand %vm2498_vm0, %vm1962_vm9 }
  0x18   : > { %v227_v0 = vld [vmem:[%s223_s9] sm:$0xff]  ;;  %vm1958_vm8 = vmand %vm2500_vm2, %vm1942_vm3 }
  0x19   : > { %v228_v1 = vmul.f32 1.9896946, %v227_v0  ;;  %vm1994_vm14 = vmand %vm2500_vm2, %vm1966_vm10 }
  0x1b   : > { %v1901_v2 = vadd.f32 -0.9948473, %v228_v1 }
  0x1d   : > { %v248_v3 = vcombine.high %v1901_v2, %v1901_v2 }
  0x1f   : > { %v1499_v4 = vpack.i.bf16 %v1901_v2, %v248_v3  ;;  %v1344_v5 = vpack.c.bf16 %v248_v3, %v1901_v2  ;;  %v1519_v6 = vpack.i.bf16 %v248_v3, %v1901_v2 }
  0x21   : > { %1500 = vrot.lane.b32.xlu0 %v1499_v4, %s1808_s10  ;;  %1510 = vrot.lane.b32.xlu1 %v1499_v4, %s1809_s11  ;;  %348 = vst [vmem:[#allocation2 + $0x10] sm:$0x33] %v1344_v5 }
  0x25   : > { %1505 = vrot.lane.b32.xlu0 %v1499_v4, %s1810_s12  ;;  %1515 = vrot.lane.b32.xlu1 %v1499_v4, %s1811_s13 }
  0x29   : > { %1520 = vrot.lane.b32.xlu0 %v1519_v6, %s1812_s14  ;;  %1525 = vrot.lane.b32.xlu1 %v1519_v6, %s1813_s15 }
  0x2d   : > { %1530 = vrot.lane.b32.xlu0 %v1519_v6, %s1814_s16  ;;  %1535 = vrot.lane.b32.xlu1 %v1519_v6, %s1815_s17 }
  0x31   : > { %454 = vperm.xlu0 %1539, %v448_v8   ;;  %459 = vperm.xlu1 %1540, %v449_v9  }
  0x35   : > { %464 = vperm.xlu1 %1540, %v450_v10   ;;  %469 = vperm.xlu0 %1539, %v451_v11   ;;  %v2533_v11 = vmov 0 }
  0x93   : > { %v1501_v23 = vpop.permute.xlu0 %1500  ;;  %v1511_v25 = vpop.permute.xlu1 %1510 }
  0x94   : > { %v1503_v26 = vunpack.i.h.bf16 %v1501_v23  ;;  %v1502_v27 = vunpack.i.l.bf16 %v1501_v23  ;;  %v1513_v29 = vunpack.i.h.bf16 %v1511_v25  ;;  %v1512_v30 = vunpack.i.l.bf16 %v1511_v25 }
  0x96   : > { %v278_v33 = vsel %vm2497_vm4, %v1503_v26, %v1502_v27  ;;  %v281_v34 = vsel %vm2497_vm4, %v1502_v27, %v1503_v26  ;;  %v255_v35 = vsel %vm2504_vm5, %v1513_v29, %v1512_v30  ;;  %v258_v36 = vsel %vm2504_vm5, %v1512_v30, %v1513_v29 }
  0x97   : > { %v282_v37 = vsel %vm2498_vm0, %v281_v34, 0.0  ;;  %v283_v38 = vsel %vm2500_vm2, %v278_v33, 0.0  ;;  %v261_v39 = vsel %vm1950_vm6, %v258_v36, 0.0  ;;  %v262_v40 = vsel %vm1958_vm8, %v255_v35, 0.0  ;;  %v1506_v41 = vpop.permute.xlu0 %1505  ;;  %v1516_v42 = vpop.permute.xlu1 %1515 }
  0x98   : > { %v1341_v43 = vpack.c.bf16 %v283_v38, %v282_v37  ;;  %v1340_v44 = vpack.c.bf16 %v262_v40, %v261_v39  ;;  %v1508_v45 = vunpack.i.h.bf16 %v1506_v41  ;;  %v1507_v46 = vunpack.i.l.bf16 %v1506_v41 }
  0x99   : > { %v1518_v49 = vunpack.i.h.bf16 %v1516_v42  ;;  %v1517_v50 = vunpack.i.l.bf16 %v1516_v42  ;;  %vm2506_vm4 = vcmp.le.s32.totalorder %v1934_v19, 14  ;;  %vm2502_vm0 = vcmask 916480  }
  0x9a   : > { %v291_v51 = vrot.slane %v1341_v43, 6  ;;  %271 = vst [vmem:[#allocation2] sm:$0x33] %v1340_v44  ;;  %v323_v52 = vsel %vm2499_vm7, %v1508_v45, %v1507_v46  ;;  %v326_v53 = vsel %vm2499_vm7, %v1507_v46, %v1508_v45  ;;  %vm2508_vm7 = vcmask 924672   ;;  %vm2052_vm5 = vmand %vm2506_vm4, %vm1966_vm10 }
  0x9b   : > { %v327_v54 = vsel %vm1937_vm1, %v326_v53, 0.0  ;;  %v328_v55 = vsel %vm1942_vm3, %v323_v52, 0.0  ;;  %v300_v56 = vsel %vm2501_vm11, %v1518_v49, %v1517_v50  ;;  %v303_v57 = vsel %vm2501_vm11, %v1517_v50, %v1518_v49  ;;  %v1521_v58 = vpop.permute.xlu0 %1520  ;;  %v1526_v59 = vpop.permute.xlu1 %1525  ;;  %vm2020_vm11 = vmand %vm2505_vm15, %vm1937_vm1 }
  0x9c   : > { %293 = vst [vmem:[#allocation2] sm:$0xcc] %v291_v51  ;;  %v1343_v60 = vpack.c.bf16 %v328_v55, %v327_v54  ;;  %v306_v61 = vsel %vm1986_vm13, %v303_v57, 0.0  ;;  %v307_v62 = vsel %vm1994_vm14, %v300_v56, 0.0  ;;  %v1523_v63 = vunpack.i.h.bf16 %v1521_v58 }
  0x9d   : > { %v1342_v0 = vpack.c.bf16 %v307_v62, %v306_v61  ;;  %v1522_v1 = vunpack.i.l.bf16 %v1521_v58  ;;  %v1528_v3 = vunpack.i.h.bf16 %v1526_v59  ;;  %v1527_v4 = vunpack.i.l.bf16 %v1526_v59  ;;  %v1709_v58 = vld [vmem:[%s2492_s1] sm:$0xff]   ;;  %v1710_v59 = vld [vmem:[%s2492_s1 + $0x8] sm:$0xff]  }
  0x9e   : > { %v336_v5 = vrot.slane %v1343_v60, 6  ;;  %vm2507_vm2 = vcmask 908288   ;;  %v2534_v11 = vsel %vm2020_vm11, 4294967295, %v2533_v11  ;;  %v2537_v30 = vmov 0 }
  0x9f   : > { %316 = vst [vmem:[#allocation2 + $0x8] sm:$0x33] %v1342_v0  ;;  %v354_v6 = vsel %vm2503_vm12, %v1522_v1, %v1523_v63  ;;  %v358_v8 = vsel %vm2503_vm12, %v1523_v63, %v1522_v1  ;;  %v399_v9 = vsel %vm2502_vm0, %v1527_v4, %v1528_v3  ;;  %v403_v10 = vsel %vm2502_vm0, %v1528_v3, %v1527_v4  ;;  %v1531_v13 = vpop.permute.xlu0 %1530  ;;  %v1536_v14 = vpop.permute.xlu1 %1535  ;;  %vm2036_vm0 = vmand %vm2506_vm4, %vm1942_vm3 }
  0xa0   : > { %338 = vst [vmem:[#allocation2 + $0x8] sm:$0xcc] %v336_v5  ;;  %v359_v15 = vsel %vm1962_vm9, %v354_v6, 0.0  ;;  %v360_v16 = vsel %vm1966_vm10, %v358_v8, 0.0  ;;  %v404_v18 = vsel %vm2505_vm15, %v399_v9, 0.0  ;;  %v405_v20 = vsel %vm2506_vm4, %v403_v10, 0.0  ;;  %vm2044_vm12 = vmand %vm2505_vm15, %vm1962_vm9 }
  0xa1   : > { %v1345_v25 = vpack.c.bf16 %v360_v16, %v359_v15  ;;  %v1347_v26 = vpack.c.bf16 %v405_v20, %v404_v18  ;;  %v1533_v27 = vunpack.i.h.bf16 %v1531_v13  ;;  %v1532_v29 = vunpack.i.l.bf16 %v1531_v13 }
  0xa2   : > { %v2538_v30 = vsel %vm2044_vm12, 4294967295, %v2537_v30  ;;  %v2539_v33 = vmov 0  ;;  %v1538_v34 = vunpack.i.h.bf16 %v1536_v14  ;;  %v1537_v35 = vunpack.i.l.bf16 %v1536_v14 }
  0xa3   : > { %v2540_v33 = vsel %vm2052_vm5, 4294967295, %v2539_v33  ;;  %v368_v36 = vrot.slane %v1345_v25, 6  ;;  %v413_v37 = vrot.slane %v1347_v26, 6  ;;  %v376_v38 = vsel %vm2508_vm7, %v1532_v29, %v1533_v27 }
  0xa4   : > { %v380_v39 = vsel %vm2508_vm7, %v1533_v27, %v1532_v29  ;;  %v383_v40 = vsel %vm2020_vm11, %v376_v38, 0.0  ;;  %v421_v42 = vsel %vm2507_vm2, %v1537_v35, %v1538_v34  ;;  %v425_v43 = vsel %vm2507_vm2, %v1538_v34, %v1537_v35  ;;  %vm1350_vm2 = vmpackc.low %vm1958_vm8, %vm1958_vm8 }
  0xa5   : > { %v384_v41 = vsel %vm2036_vm0, %v380_v39, 0.0  ;;  %370 = vst [vmem:[#allocation2 + $0x10] sm:$0xcc] %v368_v36  ;;  %415 = vst [vmem:[#allocation2 + $0x18] sm:$0xcc] %v413_v37  ;;  %v428_v45 = vsel %vm2044_vm12, %v421_v42, 0.0 }
  0xa6   : > { %v1346_v44 = vpack.c.bf16 %v384_v41, %v383_v40  ;;  %v429_v46 = vsel %vm2052_vm5, %v425_v43, 0.0  ;;  %vm514_vm15 = vcmask 1041408   ;;  %vm507_vm4 = vcmask 293888   ;;  %vm1353_vm5 = vmpackc.low %vm1950_vm6, %vm1950_vm6 }
  0xa7   : > { %v1348_v49 = vpack.c.bf16 %v429_v46, %v428_v45  ;;  %v1701_v50 = vld [vmem:[#allocation2 + $0x4] ss:$8 sps:$4 sm:$0xff]   ;;  %v1703_v51 = vld [vmem:[#allocation2] ss:$8 sps:$4 sm:$0xff]   ;;  %vm2552_vm11 = vcmp.ge.s32.totalorder %v1934_v19, 1 }
  0xa8   : > { %393 = vst [vmem:[#allocation2 + $0x18] sm:$0x33] %v1346_v44  ;;  %521 = vmatprep.subr.bf16.mxu0 %v1701_v50  ;;  %vm2202_vm8 = vmpackc.low %vm2552_vm11, %vm2552_vm11 }
  0xa9   : > { %438 = vst [vmem:[#allocation2 + $0x20] sm:$0x33] %v1348_v49  ;;  %522 = vmatpush1.bf16.msra.mxu0 %v1703_v51 }
  0xaf   : > { %v1704_v52 = vld [vmem:[#allocation2 + $0x14] ss:$8 sps:$4 sm:$0xff]   ;;  %v1706_v53 = vld [vmem:[#allocation2 + $0x10] ss:$8 sps:$4 sm:$0xff]  }
  0xb0   : > { %v447_v54 = vld [vmem:[#allocation2 + $0x20] sm:$0x33]  ;;  %523 = vmatprep.subr.bf16.mxu0 %v1704_v52  ;;  %v455_v60 = vpop.permute.xlu0 %454  ;;  %v460_v62 = vpop.permute.xlu1 %459 }
  0xb1   : > { %v1321_v55 = vcombine.high %v447_v54, %v447_v54  ;;  %v1320_v56 = vcombine.low %v447_v54, %v447_v54  ;;  %524 = vmatpush1.bf16.msra.mxu0 %v1706_v53 }
  0xb3   : > { %1322 = vmatprep.subr.msk.bf16.mxu0 %vm514_vm15, %v1321_v55  ;;  %v516_v57 = vsel %vm514_vm15, %v1320_v56, 0 }
  0xb4   : > { %v465_v14 = vpop.permute.xlu1 %464  ;;  %v470_v18 = vpop.permute.xlu0 %469 }
  0xb5   : > { %526 = vmatpush1.bf16.msra.mxu0 %v516_v57 }
  0xb8   : > { %1323 = vmatmul.mubr.msk.bf16.vlgmr.msra.gmra.mrb[0].mxu0 %vm507_vm4, %v1709_v58 }
  0xb9   : > { %563 = vmatprep.mubr.bf16.mxu0 %v1816_v7 }
  0xc0   : > { %1324 = vmatmul.mubr.msk.bf16.gmra.mrb[4].mxu0 %vm507_vm4, %v1710_v59  ;;  %vm2541_vm4 = vcmask 138240  }
  0xc1   : > { %1201 = vmatprep.mubr.bf16.mxu0 %v1816_v7  ;;  %vm2542_vm15 = vmmov %vm2541_vm4 }
  0xc2   : > { %vm2543_vm7 = vmmov %vm2541_vm4 }
  0xc3   : > { %vm2544_vm12 = vmmov %vm2541_vm4 }
 0x18b   : > { %v555_v61 = vpop.f32.mrb[0].mxu0 }
 0x18c   : > { %v556_v63 = vadd.f32 %v555_v61, %v455_v60  ;;  %v557_v0 = vpop.f32.mrb[1].mxu0 }
 0x18d   : > { %v558_v1 = vadd.f32 %v557_v0, %v455_v60  ;;  %v559_v3 = vpop.f32.mrb[2].mxu0 }
 0x18e   : > { %v1325_v4 = vmul.f32 -1.442695, %v556_v63  ;;  %v560_v5 = vadd.f32 %v559_v3, %v460_v62  ;;  %v561_v6 = vpop.f32.mrb[3].mxu0 }
 0x18f   : > { %v1326_v8 = vmul.f32 -1.442695, %v558_v1  ;;  %v562_v9 = vadd.f32 %v561_v6, %v460_v62 }
 0x190   : > { %1712 = vpow2.f32 %v1325_v4  ;;  %v1327_v10 = vmul.f32 -1.442695, %v560_v5 }
 0x191   : > { %1714 = vpow2.f32 %v1326_v8  ;;  %v1328_v13 = vmul.f32 -1.442695, %v562_v9 }
 0x192   : > { %1716 = vpow2.f32 %v1327_v10 }
 0x193   : > { %1718 = vpow2.f32 %v1328_v13  ;;  %v565_v7 = vpop.f32.mrb[4].mxu0 }
 0x194   : > { %v566_v15 = vadd.f32 %v565_v7, %v465_v14  ;;  %v567_v16 = vpop.f32.mrb[5].mxu0 }
 0x195   : > { %v568_v20 = vadd.f32 %v567_v16, %v465_v14  ;;  %v569_v25 = vpop.f32.mrb[6].mxu0 }
 0x196   : > { %v1329_v26 = vmul.f32 -1.442695, %v566_v15  ;;  %v570_v27 = vadd.f32 %v569_v25, %v470_v18  ;;  %v571_v29 = vpop.f32.mrb[7].mxu0 }
 0x197   : > { %v1330_v34 = vmul.f32 -1.442695, %v568_v20  ;;  %v572_v35 = vadd.f32 %v571_v29, %v470_v18 }
 0x198   : > { %1720 = vpow2.f32 %v1329_v26  ;;  %v1331_v36 = vmul.f32 -1.442695, %v570_v27 }
 0x199   : > { %1722 = vpow2.f32 %v1330_v34  ;;  %v1332_v37 = vmul.f32 -1.442695, %v572_v35  ;;  %v1817_v34 = vmov 1983009808  }
 0x19a   : > { %v1713_v38 = vpop.eup %1712  ;;  %1724 = vpow2.f32 %v1331_v36 }
 0x19b   : > { %v1715_v39 = vpop.eup %1714  ;;  %v598_v40 = vadd.f32 1.0, %v1713_v38  ;;  %1726 = vpow2.f32 %v1332_v37  ;;  %v1111_v37 = vshrl.u32 %v230_v12, 7  ;;  %v1062_v38 = vld [vmem:[%s2494_s3] sm:$0x3f] }
 0x19c   : > { %v1717_v41 = vpop.eup %1716  ;;  %v599_v42 = vadd.f32 1.0, %v1715_v39  ;;  %v1099_v12 = vld [vmem:[%s2495_s4] sm:$0xf] }
 0x19d   : > { %v1719_v43 = vpop.eup %1718  ;;  %1728 = vrcp.f32 %v598_v40  ;;  %v600_v44 = vadd.f32 1.0, %v1717_v41  ;;  %v1106_v40 = vcombine.high %v1062_v38, %v1062_v38 }
 0x19e   : > { %1730 = vrcp.f32 %v599_v42  ;;  %v601_v45 = vadd.f32 1.0, %v1719_v43 }
 0x19f   : > { %1732 = vrcp.f32 %v600_v44 }
 0x1a0   : > { %1734 = vrcp.f32 %v601_v45 }
 0x1a2   : > { %v1721_v46 = vpop.eup %1720 }
 0x1a3   : > { %v1723_v49 = vpop.eup %1722  ;;  %v602_v50 = vadd.f32 1.0, %v1721_v46 }
 0x1a4   : > { %v1725_v51 = vpop.eup %1724  ;;  %v603_v52 = vadd.f32 1.0, %v1723_v49 }
 0x1a5   : > { %v1727_v53 = vpop.eup %1726  ;;  %1736 = vrcp.f32 %v602_v50  ;;  %v604_v54 = vadd.f32 1.0, %v1725_v51 }
 0x1a6   : > { %1738 = vrcp.f32 %v603_v52  ;;  %v605_v55 = vadd.f32 1.0, %v1727_v53 }
 0x1a7   : > { %v1729_v56 = vpop.eup %1728  ;;  %1740 = vrcp.f32 %v604_v54 }
 0x1a8   : > { %v1731_v57 = vpop.eup %1730  ;;  %v2076_v58 = vmul.f32 %v1729_v56, %v556_v63  ;;  %1742 = vrcp.f32 %v605_v55 }
 0x1a9   : > { %v1733_v59 = vpop.eup %1732  ;;  %v2078_v60 = vmul.f32 %v1731_v57, %v558_v1 }
 0x1aa   : > { %v1735_v61 = vpop.eup %1734  ;;  %v2080_v62 = vmul.f32 %v1733_v59, %v560_v5 }
 0x1ab   : > { %v2082_v0 = vmul.f32 %v1735_v61, %v562_v9  ;;  %v1621_v3 = vpack.i.bf16 %v2078_v60, %v2076_v58 }
 0x1ac   : > { %v1541_v4 = vpack.i.bf16 %v2080_v62, %v2076_v58  ;;  %v846_v8 = vpack.c.bf16 %v2080_v62, %v2076_v58 }
 0x1ad   : > { %v1546_v6 = vpack.i.bf16 %v2082_v0, %v2078_v60  ;;  %v1626_v63 = vpack.i.bf16 %v2082_v0, %v2080_v62  ;;  %v847_v5 = vpack.c.bf16 %v2082_v0, %v2078_v60 }
 0x1ae   : > { %1542 = vrot.lane.b32.xlu0 %v1541_v4, %s1809_s11 }
 0x1af   : > { %v1737_v1 = vpop.eup %1736  ;;  %1547 = vrot.lane.b32.xlu1 %v1546_v6, %s1809_s11 }
 0x1b0   : > { %v1739_v9 = vpop.eup %1738  ;;  %v2098_v10 = vmul.f32 %v1737_v1, %v566_v15 }
 0x1b1   : > { %v1741_v13 = vpop.eup %1740  ;;  %v2100_v14 = vmul.f32 %v1739_v9, %v568_v20 }
 0x1b2   : > { %v1743_v7 = vpop.eup %1742  ;;  %v2102_v16 = vmul.f32 %v1741_v13, %v570_v27 }
 0x1b3   : > { %v2104_v18 = vmul.f32 %v1743_v7, %v572_v35  ;;  %v1631_v25 = vpack.i.bf16 %v2100_v14, %v2098_v10  ;;  %v1108_v35 = vunpack.c.l.s4 %v1817_v34 }
 0x1b4   : > { %v1551_v26 = vpack.i.bf16 %v2102_v16, %v2098_v10  ;;  %v848_v27 = vpack.c.bf16 %v2102_v16, %v2098_v10 }
 0x1b5   : > { %v1556_v29 = vpack.i.bf16 %v2104_v18, %v2100_v14  ;;  %v1656_v15 = vpack.i.bf16 %v2104_v18, %v2102_v16  ;;  %v849_v20 = vpack.c.bf16 %v2104_v18, %v2100_v14  ;;  %v1109_v36 = vunpack.c.0.s8 %v1108_v35 }
 0x1b6   : > { %1552 = vrot.lane.b32.xlu0 %v1551_v26, %s1809_s11 }
 0x1b7   : > { %1557 = vrot.lane.b32.xlu1 %v1556_v29, %s1809_s11  ;;  %v1112_v39 = vsub.s32 %v1109_v36, %v1111_v37 }
 0x1b9   : > { %v2149_v41 = vrot.slane %v1062_v38, %v1112_v39  ;;  %v2152_v42 = vrot.slane %v1106_v40, %v1112_v39 }
 0x1ba   : > { %1567 = vrot.lane.b32.xlu0 %v1541_v4, %s1808_s10 }
 0x1bb   : > { %1562 = vrot.lane.b32.xlu1 %v1546_v6, %s1808_s10  ;;  %v1121_v43 = vcombine.high %v2149_v41, %v2149_v41 }
 0x1bd   : > { %1160 = vmatprep.mubr.bf16.mxu1 %v1121_v43 }
 0x1be   : > { %1572 = vrot.lane.b32.xlu0 %v1551_v26, %s1808_s10 }
 0x1bf   : > { %1577 = vrot.lane.b32.xlu1 %v1556_v29, %s1808_s10 }
 0x1c2   : > { %1587 = vrot.lane.b32.xlu0 %v1541_v4, %s1811_s13 }
 0x1c3   : > { %1582 = vrot.lane.b32.xlu1 %v1546_v6, %s1811_s13 }
 0x1c6   : > { %1592 = vrot.lane.b32.xlu0 %v1551_v26, %s1811_s13 }
 0x1c7   : > { %1597 = vrot.lane.b32.xlu1 %v1556_v29, %s1811_s13 }
 0x1ca   : > { %1607 = vrot.lane.b32.xlu0 %v1541_v4, %s1810_s12 }
 0x1cb   : > { %1602 = vrot.lane.b32.xlu1 %v1546_v6, %s1810_s12 }
 0x1ce   : > { %1617 = vrot.lane.b32.xlu0 %v1551_v26, %s1810_s12 }
 0x1cf   : > { %1612 = vrot.lane.b32.xlu1 %v1556_v29, %s1810_s12 }
 0x1d2   : > { %1627 = vrot.lane.b32.xlu0 %v1626_v63, %s1812_s14 }
 0x1d3   : > { %1622 = vrot.lane.b32.xlu1 %v1621_v3, %s1812_s14 }
 0x1d6   : > { %1642 = vrot.lane.b32.xlu0 %v1626_v63, %s1814_s16 }
 0x1d7   : > { %1632 = vrot.lane.b32.xlu1 %v1631_v25, %s1812_s14 }
 0x1da   : > { %1657 = vrot.lane.b32.xlu0 %v1656_v15, %s1812_s14  ;;  %s216_s14 = sand.u32 1, %s1798_s19  }
 0x1db   : > { %1637 = vrot.lane.b32.xlu1 %v1621_v3, %s1814_s16  ;;  %s1224_s23 = scalar_lea.sflag [#allocation5], %s216_s14 }
 0x1de   : > { %1662 = vrot.lane.b32.xlu0 %v1626_v63, %s1813_s15 }
 0x1df   : > { %1647 = vrot.lane.b32.xlu1 %v1631_v25, %s1814_s16 }
 0x1e2   : > { %1672 = vrot.lane.b32.xlu0 %v1656_v15, %s1814_s16  ;;  %s1349_s16 = sshll.u32 %s1870_s22, 7  ;;  %s1818_s22 = smov [#allocation4]  }
 0x1e3   : > { %1652 = vrot.lane.b32.xlu1 %v1621_v3, %s1813_s15  ;;  %s2449_s9 = scalar_lea.hbm %s2496_s5, %s1349_s16  ;;  %s1748_s26 = sshll.u32 %s1818_s22, 4  ;;  %s1749_s26 = int_to_ptr.vmem [resolvable:$false] %s1748_s26 }
 0x1e4   : > { %s1750_s30 = scalar_lea.vmem %s1749_s26, 256 }
 0x1e6   : > { %1677 = vrot.lane.b32.xlu0 %v1626_v63, %s1815_s17 }
 0x1e7   : > { %1667 = vrot.lane.b32.xlu1 %v1621_v3, %s1815_s17 }
 0x1ea   : > { %1692 = vrot.lane.b32.xlu0 %v1656_v15, %s1813_s15 }
 0x1eb   : > { %1682 = vrot.lane.b32.xlu1 %v1631_v25, %s1813_s15  ;;  %s1301_s15 = sshll.u32 %s216_s14, 3 }
 0x1ee   : > { %1697 = vrot.lane.b32.xlu0 %v1656_v15, %s1815_s17 }
 0x1ef   : > { %1687 = vrot.lane.b32.xlu1 %v1631_v25, %s1815_s17  ;;  %s218_s17 = scalar_lea.vmem [#allocation4], %s1301_s15 }
 0x1f0   : > { %s1238_s6 = sshll.u32 %s218_s17, 4  ;;  %s2451_s6 = int_to_ptr.vmem [resolvable:$true] %s1238_s6 }
 0x1f1   : > { %s1744_s25 = scalar_lea.vmem %s2451_s6, 128  ;;  %p1751_p0 = scmp.lt.s32.totalorder %s2451_s6, %s1749_s26 }
 0x1f2   : > { %p1745_p11 = scmp.ne.s32.totalorder %s2451_s6, %s1744_s25  ;;  %p1752_p1 = scmp.lt.s32.totalorder %s1750_s30, %s1744_s25 }
 0x1f3   : > { %1102 = vperm.xlu1 %1540, %v1099_v12  }
 0x1f4   : > { %p1746_p12 = pnand %p1745_p11, %p1887_p5  ;;  %p1753_p2 = por %p1752_p1, %p1751_p0 }
 0x1f6   : > { %p1747_p13 = pneg %p1746_p12 }
 0x1f8   : > { %p1754_p3 = pnand %p1753_p2, %p1747_p13 }
 0x220   : > { %v1543_v44 = vpop.permute.xlu0 %1542 }
 0x221   : > { %v1545_v45 = vunpack.i.h.bf16 %v1543_v44  ;;  %v1544_v46 = vunpack.i.l.bf16 %v1543_v44  ;;  %v1548_v49 = vpop.permute.xlu1 %1547 }
 0x222   : > { %v1550_v50 = vunpack.i.h.bf16 %v1548_v49  ;;  %v1549_v51 = vunpack.i.l.bf16 %v1548_v49 }
 0x224   : > { %v658_v52 = vsel %vm2541_vm4, %v1544_v46, %v1549_v51  ;;  %v659_v53 = vsel %vm2542_vm15, %v1545_v45, %v1550_v50  ;;  %v670_v54 = vsel %vm2543_vm7, %v1549_v51, %v1544_v46  ;;  %v671_v55 = vsel %vm2544_vm12, %v1550_v50, %v1545_v45  ;;  %vm2545_vm7 = vmmov %vm2541_vm4 }
 0x225   : > { %v1351_v56 = vpack.c.bf16 %v659_v53, %v658_v52  ;;  %v1354_v57 = vpack.c.bf16 %v671_v55, %v670_v54  ;;  %vm2546_vm12 = vmmov %vm2541_vm4 }
 0x226   : > { %vm2547_vm15 = vmmov %vm2541_vm4 }
 0x227   : > { %1352 = vmatprep.subr.msk.bf16.mxu1 %vm1350_vm2, %v1351_v56 }
 0x228   : > { %v1553_v59 = vpop.permute.xlu0 %1552  ;;  %1355 = vmatpush1.bf16.msk.msra.mxu1 %vm1353_vm5, %v1354_v57 }
 0x229   : > { %v1555_v61 = vunpack.i.h.bf16 %v1553_v59  ;;  %v1554_v3 = vunpack.i.l.bf16 %v1553_v59  ;;  %v1558_v4 = vpop.permute.xlu1 %1557 }
 0x22a   : > { %v1560_v6 = vunpack.i.h.bf16 %v1558_v4  ;;  %v1559_v63 = vunpack.i.l.bf16 %v1558_v4 }
 0x22c   : > { %v660_v1 = vsel %vm2545_vm7, %v1554_v3, %v1559_v63  ;;  %v661_v9 = vsel %vm2546_vm12, %v1555_v61, %v1560_v6  ;;  %v672_v13 = vsel %vm2541_vm4, %v1559_v63, %v1554_v3  ;;  %v673_v7 = vsel %vm2547_vm15, %v1560_v6, %v1555_v61  ;;  %v1568_v25 = vpop.permute.xlu0 %1567 }
 0x22d   : > { %v1357_v26 = vpack.c.bf16 %v661_v9, %v660_v1  ;;  %v1360_v29 = vpack.c.bf16 %v673_v7, %v672_v13  ;;  %v1570_v15 = vunpack.i.h.bf16 %v1568_v25  ;;  %v1569_v34 = vunpack.i.l.bf16 %v1568_v25  ;;  %v1563_v35 = vpop.permute.xlu1 %1562 }
 0x22e   : > { %v1565_v36 = vunpack.i.h.bf16 %v1563_v35  ;;  %v1564_v37 = vunpack.i.l.bf16 %v1563_v35  ;;  %vm2548_vm7 = vcmask 130048  }
 0x22f   : > { %1358 = vmatprep.subr.msk.bf16.mxu1 %vm1350_vm2, %v1357_v26  ;;  %vm2549_vm12 = vmmov %vm2548_vm7  ;;  %vm2555_vm2 = vcmp.ge.s32.totalorder %v1932_v17, 1 }
 0x230   : > { %v710_v38 = vsel %vm2548_vm7, %v1569_v34, %v1564_v37  ;;  %v711_v39 = vsel %vm2549_vm12, %v1570_v15, %v1565_v36  ;;  %vm2550_vm4 = vmmov %vm2548_vm7  ;;  %v1573_v12 = vpop.permute.xlu0 %1572  ;;  %1361 = vmatpush1.bf16.msk.msra.mxu1 %vm1353_vm5, %v1360_v29 }
 0x231   : > { %v722_v40 = vsel %vm2550_vm4, %v1564_v37, %v1569_v34  ;;  %vm2551_vm15 = vmmov %vm2550_vm4  ;;  %v1363_v44 = vpack.c.bf16 %v711_v39, %v710_v38  ;;  %v1575_v46 = vunpack.i.h.bf16 %v1573_v12  ;;  %v1574_v49 = vunpack.i.l.bf16 %v1573_v12  ;;  %v1578_v50 = vpop.permute.xlu1 %1577 }
 0x232   : > { %v723_v43 = vsel %vm2551_vm15, %v1565_v36, %v1570_v15  ;;  %vm2209_vm7 = vmpackc.low %vm2555_vm2, %vm2555_vm2  ;;  %v1580_v24 = vunpack.i.h.bf16 %v1578_v50  ;;  %v1579_v52 = vunpack.i.l.bf16 %v1578_v50 }
 0x233   : > { %v1366_v45 = vpack.c.bf16 %v723_v43, %v722_v40  ;;  %1364 = vmatprep.subr.msk.bf16.mxu1 %vm2202_vm8, %v1363_v44  ;;  %vm2558_vm5 = vmmov %vm2550_vm4 }
 0x234   : > { %v712_v53 = vsel %vm2558_vm5, %v1574_v49, %v1579_v52  ;;  %vm2559_vm6 = vmmov %vm2550_vm4  ;;  %v1588_v57 = vpop.permute.xlu0 %1587 }
 0x235   : > { %v713_v54 = vsel %vm2559_vm6, %v1575_v46, %v1580_v24  ;;  %vm2560_vm11 = vmmov %vm2550_vm4  ;;  %1367 = vmatpush1.bf16.msk.msra.mxu1 %vm2209_vm7, %v1366_v45  ;;  %v1590_v3 = vunpack.i.h.bf16 %v1588_v57  ;;  %v1589_v4 = vunpack.i.l.bf16 %v1588_v57  ;;  %v1583_v6 = vpop.permute.xlu1 %1582 }
 0x236   : > { %v724_v55 = vsel %vm2560_vm11, %v1579_v52, %v1574_v49  ;;  %vm2561_vm12 = vmmov %vm2550_vm4  ;;  %v1369_v59 = vpack.c.bf16 %v713_v54, %v712_v53  ;;  %v1585_v63 = vunpack.i.h.bf16 %v1583_v6  ;;  %v1584_v1 = vunpack.i.l.bf16 %v1583_v6 }
 0x237   : > { %v725_v56 = vsel %vm2561_vm12, %v1580_v24, %v1575_v46  ;;  %vm2562_vm4 = vcmask 121856   ;;  %vm1374_vm6 = vmpackc.low %vm1994_vm14, %vm1994_vm14 }
 0x238   : > { %v1372_v61 = vpack.c.bf16 %v725_v56, %v724_v55  ;;  %1370 = vmatprep.subr.msk.bf16.mxu1 %vm2202_vm8, %v1369_v59  ;;  %v762_v9 = vsel %vm2562_vm4, %v1589_v4, %v1584_v1  ;;  %vm2563_vm15 = vmmov %vm2562_vm4  ;;  %v1593_v26 = vpop.permute.xlu0 %1592 }
 0x239   : > { %v763_v13 = vsel %vm2563_vm15, %v1590_v3, %v1585_v63  ;;  %vm2564_vm2 = vmmov %vm2562_vm4  ;;  %v1595_v34 = vunpack.i.h.bf16 %v1593_v26  ;;  %v1594_v35 = vunpack.i.l.bf16 %v1593_v26  ;;  %v1598_v36 = vpop.permute.xlu1 %1597  ;;  %vm2570_vm15 = vcmask 7168  }
 0x23a   : > { %v774_v7 = vsel %vm2564_vm2, %v1584_v1, %v1589_v4  ;;  %vm2565_vm5 = vmmov %vm2564_vm2  ;;  %1373 = vmatpush1.bf16.msk.msra.mxu1 %vm2209_vm7, %v1372_v61  ;;  %v1375_v29 = vpack.c.bf16 %v763_v13, %v762_v9  ;;  %v1600_v37 = vunpack.i.h.bf16 %v1598_v36  ;;  %v1599_v38 = vunpack.i.l.bf16 %v1598_v36 }
 0x23b   : > { %v775_v25 = vsel %vm2565_vm5, %v1585_v63, %v1590_v3  ;;  %vm1377_vm8 = vmpackc.low %vm1986_vm13, %vm1986_vm13 }
 0x23c   : > { %v1378_v15 = vpack.c.bf16 %v775_v25, %v774_v7  ;;  %1376 = vmatprep.subr.msk.bf16.mxu1 %vm1374_vm6, %v1375_v29  ;;  %vm2566_vm7 = vmmov %vm2564_vm2  ;;  %v1608_v28 = vpop.permute.xlu0 %1607 }
 0x23d   : > { %v764_v39 = vsel %vm2566_vm7, %v1594_v35, %v1599_v38  ;;  %vm2567_vm11 = vmmov %vm2564_vm2  ;;  %v1610_v46 = vunpack.i.h.bf16 %v1608_v28  ;;  %v1609_v49 = vunpack.i.l.bf16 %v1608_v28  ;;  %v1603_v50 = vpop.permute.xlu1 %1602 }
 0x23e   : > { %v765_v40 = vsel %vm2567_vm11, %v1595_v34, %v1600_v37  ;;  %vm2568_vm12 = vmmov %vm2564_vm2  ;;  %1379 = vmatpush1.bf16.msk.msra.mxu1 %vm1377_vm8, %v1378_v15  ;;  %v1605_v51 = vunpack.i.h.bf16 %v1603_v50  ;;  %v1604_v24 = vunpack.i.l.bf16 %v1603_v50 }
 0x23f   : > { %v776_v43 = vsel %vm2568_vm12, %v1599_v38, %v1594_v35  ;;  %vm2569_vm4 = vmmov %vm2564_vm2  ;;  %v1381_v44 = vpack.c.bf16 %v765_v40, %v764_v39 }
 0x240   : > { %v777_v12 = vsel %vm2569_vm4, %v1600_v37, %v1595_v34  ;;  %v814_v52 = vsel %vm2570_vm15, %v1609_v49, %v1604_v24  ;;  %vm2571_vm2 = vmmov %vm2570_vm15  ;;  %v1618_v56 = vpop.permute.xlu0 %1617  ;;  %vm2578_vm4 = vcmask 1039360  }
 0x241   : > { %v1384_v45 = vpack.c.bf16 %v777_v12, %v776_v43  ;;  %1382 = vmatprep.subr.msk.bf16.mxu1 %vm1374_vm6, %v1381_v44  ;;  %v815_v53 = vsel %vm2571_vm2, %v1610_v46, %v1605_v51  ;;  %vm2572_vm5 = vmmov %vm2571_vm2  ;;  %v1620_v59 = vunpack.i.h.bf16 %v1618_v56  ;;  %v1619_v61 = vunpack.i.l.bf16 %v1618_v56  ;;  %v1613_v3 = vpop.permute.xlu1 %1612 }
 0x242   : > { %v826_v54 = vsel %vm2572_vm5, %v1604_v24, %v1609_v49  ;;  %vm2573_vm7 = vmmov %vm2571_vm2  ;;  %v1387_v48 = vpack.c.bf16 %v815_v53, %v814_v52  ;;  %v1615_v4 = vunpack.i.h.bf16 %v1613_v3  ;;  %v1614_v6 = vunpack.i.l.bf16 %v1613_v3 }
 0x243   : > { %v827_v55 = vsel %vm2573_vm7, %v1605_v51, %v1610_v46  ;;  %1385 = vmatpush1.bf16.msk.msra.mxu1 %vm1377_vm8, %v1384_v45  ;;  %vm1386_vm14 = vmpackc.low %vm1942_vm3, %vm1942_vm3 }
 0x244   : > { %v1390_v57 = vpack.c.bf16 %v827_v55, %v826_v54  ;;  %vm1389_vm6 = vmpackc.low %vm1937_vm1, %vm1937_vm1  ;;  %1388 = vmatprep.subr.msk.bf16.mxu1 %vm1386_vm14, %v1387_v48  ;;  %v1628_v13 = vpop.permute.xlu0 %1627 }
 0x245   : > { %vm2574_vm13 = vmmov %vm2571_vm2  ;;  %v1623_v26 = vpop.permute.xlu1 %1622  ;;  %v1630_v29 = vunpack.i.h.bf16 %v1628_v13  ;;  %v1629_v15 = vunpack.i.l.bf16 %v1628_v13 }
 0x246   : > { %v816_v47 = vsel %vm2574_vm13, %v1619_v61, %v1614_v6  ;;  %vm2575_vm8 = vmmov %vm2571_vm2  ;;  %v1625_v34 = vunpack.i.h.bf16 %v1623_v26  ;;  %v1624_v35 = vunpack.i.l.bf16 %v1623_v26  ;;  %vm2585_vm13 = vcmask 924672  }
 0x247   : > { %v817_v63 = vsel %vm2575_vm8, %v1620_v59, %v1615_v4  ;;  %vm2576_vm11 = vmmov %vm2571_vm2  ;;  %1391 = vmatpush1.bf16.msk.msra.mxu1 %vm1389_vm6, %v1390_v57  ;;  %v887_v22 = vsel %vm2578_vm4, %v1630_v29, %v1629_v15 }
 0x248   : > { %v828_v1 = vsel %vm2576_vm11, %v1614_v6, %v1619_v61  ;;  %vm2577_vm12 = vmmov %vm2571_vm2  ;;  %v1393_v7 = vpack.c.bf16 %v817_v63, %v816_v47  ;;  %v1643_v36 = vpop.permute.xlu0 %1642 }
 0x249   : > { %v829_v9 = vsel %vm2577_vm12, %v1615_v4, %v1620_v59  ;;  %v1633_v37 = vpop.permute.xlu1 %1632  ;;  %vm2579_vm3 = vmmov %vm2578_vm4  ;;  %v1645_v14 = vunpack.i.h.bf16 %v1643_v36  ;;  %v1644_v18 = vunpack.i.l.bf16 %v1643_v36 }
 0x24a   : > { %v1396_v25 = vpack.c.bf16 %v829_v9, %v828_v1  ;;  %1394 = vmatprep.subr.msk.bf16.mxu1 %vm1386_vm14, %v1393_v7  ;;  %v886_v38 = vsel %vm2579_vm3, %v1625_v34, %v1624_v35  ;;  %v1635_v21 = vunpack.i.h.bf16 %v1633_v37  ;;  %v1634_v28 = vunpack.i.l.bf16 %v1633_v37  ;;  %vm1398_vm1 = vmpackc.low %vm1966_vm10, %vm1966_vm10 }
 0x24b   : > { %vm2580_vm15 = vmmov %vm2579_vm3  ;;  %vm2591_vm10 = vnez %v2534_v11 }
 0x24c   : > { %1397 = vmatpush1.bf16.msk.msra.mxu1 %vm1389_vm6, %v1396_v25  ;;  %v1658_v39 = vpop.permute.xlu0 %1657  ;;  %v871_v60 = vsel %vm2580_vm15, %v1629_v15, %v1630_v29  ;;  %vm2581_vm2 = vmmov %vm2579_vm3 }
 0x24d   : > { %1144 = vmatprep.subr.bf16.mxu1 %v847_v5  ;;  %v1660_v40 = vunpack.i.h.bf16 %v1658_v39  ;;  %v1659_v43 = vunpack.i.l.bf16 %v1658_v39  ;;  %v1638_v12 = vpop.permute.xlu1 %1637  ;;  %v870_v0 = vsel %vm2581_vm2, %v1624_v35, %v1625_v34  ;;  %v1399_v5 = vpack.c.bf16 %v887_v22, %v886_v38  ;;  %vm2582_vm5 = vmmov %vm2581_vm2 }
 0x24e   : > { %v1640_v62 = vunpack.i.h.bf16 %v1638_v12  ;;  %vm1401_vm7 = vmpackc.low %vm1962_vm9, %vm1962_vm9  ;;  %v1402_v45 = vpack.c.bf16 %v871_v60, %v870_v0 }
 0x24f   : > { %v889_v58 = vsel %vm2582_vm5, %v1660_v40, %v1659_v43  ;;  %vm2583_vm14 = vmmov %vm2581_vm2  ;;  %vm2594_vm5 = vcmask 908288  }
 0x250   : > { %1145 = vmatpush1.bf16.msra.mxu1 %v846_v8  ;;  %v1639_v8 = vunpack.i.l.bf16 %v1638_v12  ;;  %v2310_v44 = vpop.permute.xlu0 %1662  ;;  %v888_v46 = vsel %vm2583_vm14, %v1635_v21, %v1634_v28  ;;  %vm2584_vm6 = vmmov %vm2581_vm2 }
 0x251   : > { %1146 = vmatprep.subr.bf16.mxu1 %v849_v20  ;;  %v1648_v20 = vpop.permute.xlu1 %1647  ;;  %v873_v49 = vsel %vm2584_vm6, %v1659_v43, %v1660_v40  ;;  %v1405_v10 = vpack.c.bf16 %v889_v58, %v888_v46  ;;  %vm2586_vm8 = vmmov %vm2585_vm13  ;;  %v1665_v47 = vunpack.i.h.bf16 %v2310_v44  ;;  %v1664_v31 = vunpack.i.l.bf16 %v2310_v44 }
 0x252   : > { %v938_v16 = vsel %vm2585_vm13, %v1640_v62, %v1639_v8  ;;  %v939_v50 = vsel %vm2586_vm8, %v1645_v14, %v1644_v18  ;;  %vm2587_vm11 = vmmov %vm2581_vm2  ;;  %v1650_v56 = vunpack.i.h.bf16 %v1648_v20  ;;  %v1649_v48 = vunpack.i.l.bf16 %v1648_v20 }
 0x253   : > { %v872_v51 = vsel %vm2587_vm11, %v1634_v28, %v1635_v21  ;;  %vm2588_vm12 = vmmov %vm2586_vm8  ;;  %v1411_v57 = vpack.c.bf16 %v939_v50, %v938_v16  ;;  %vm2597_vm6 = vcmask 916480   ;;  %vm2600_vm11 = vnez %v2540_v33 }
 0x254   : > { %1147 = vmatpush1.bf16.msra.mxu1 %v848_v27  ;;  %v1673_v27 = vpop.permute.xlu0 %1672  ;;  %v1408_v54 = vpack.c.bf16 %v873_v49, %v872_v51  ;;  %v922_v55 = vsel %vm2588_vm12, %v1639_v8, %v1640_v62  ;;  %vm1410_vm4 = vmpackc.low %vm2036_vm0, %vm2036_vm0 }
 0x255   : > { %1400 = vmatprep.subr.msk.bf16.mxu1 %vm1398_vm1, %v1399_v5  ;;  %v1675_v24 = vunpack.i.h.bf16 %v1673_v27  ;;  %v1674_v52 = vunpack.i.l.bf16 %v1673_v27  ;;  %v1653_v53 = vpop.permute.xlu1 %1652  ;;  %vm2589_vm3 = vmmov %vm2586_vm8 }
 0x256   : > { %v923_v59 = vsel %vm2589_vm3, %v1644_v18, %v1645_v14  ;;  %vm2590_vm15 = vmmov %vm2589_vm3  ;;  %v1655_v3 = vunpack.i.h.bf16 %v1653_v53  ;;  %v1654_v4 = vunpack.i.l.bf16 %v1653_v53 }
 0x257   : > { %v941_v61 = vsel %vm2590_vm15, %v1675_v24, %v1674_v52  ;;  %v1414_v32 = vpack.c.bf16 %v923_v59, %v922_v55  ;;  %vm2592_vm9 = vmmov %vm2589_vm3 }
 0x258   : > { %1403 = vmatpush1.bf16.msk.msra.mxu1 %vm1401_vm7, %v1402_v45  ;;  %v1678_v6 = vpop.permute.xlu0 %1677  ;;  %v940_v13 = vsel %vm2592_vm9, %v1650_v56, %v1649_v48  ;;  %vm2593_vm2 = vmmov %vm2589_vm3  ;;  %v990_v36 = vsel %vm2597_vm6, %v1655_v3, %v1654_v4  ;;  %vm2601_vm3 = vnez %v2538_v30 }
 0x259   : > { %1406 = vmatprep.subr.msk.bf16.mxu1 %vm1398_vm1, %v1405_v10  ;;  %v1680_v63 = vunpack.i.h.bf16 %v1678_v6  ;;  %v1679_v1 = vunpack.i.l.bf16 %v1678_v6  ;;  %v1668_v9 = vpop.permute.xlu1 %1667  ;;  %vm1413_vm1 = vmpackc.low %vm2591_vm10, %vm2591_vm10  ;;  %v925_v26 = vsel %vm2593_vm2, %v1674_v52, %v1675_v24  ;;  %v1417_v29 = vpack.c.bf16 %v941_v61, %v940_v13 }
 0x25a   : > { %v1670_v7 = vunpack.i.h.bf16 %v1668_v9  ;;  %v1669_v25 = vunpack.i.l.bf16 %v1668_v9  ;;  %vm2596_vm14 = vmmov %vm2593_vm2  ;;  %vm2603_vm2 = vcmp.le.s32.totalorder %v1934_v19, 14 }
 0x25b   : > { %v1027_v15 = vsel %vm2594_vm5, %v1679_v1, %v1680_v63  ;;  %v924_v35 = vsel %vm2596_vm14, %v1649_v48, %v1650_v56  ;;  %vm2598_vm13 = vmmov %vm2594_vm5 }
 0x25c   : > { %1409 = vmatpush1.bf16.msk.msra.mxu1 %vm1401_vm7, %v1408_v54  ;;  %vm2595_vm7 = vmmov %vm2594_vm5  ;;  %v1026_v37 = vsel %vm2598_vm13, %v1669_v25, %v1670_v7  ;;  %v1693_v38 = vpop.permute.xlu0 %1692  ;;  %v1420_v60 = vpack.c.bf16 %v925_v26, %v924_v35 }
 0x25d   : > { %1412 = vmatprep.subr.msk.bf16.mxu1 %vm1410_vm4, %v1411_v57  ;;  %v1043_v34 = vsel %vm2595_vm7, %v1680_v63, %v1679_v1  ;;  %vm2599_vm8 = vmmov %vm2594_vm5  ;;  %v1438_v40 = vpack.c.bf16 %v1027_v15, %v1026_v37  ;;  %v1695_v43 = vunpack.i.h.bf16 %v1693_v38  ;;  %v1694_v12 = vunpack.i.l.bf16 %v1693_v38  ;;  %v1683_v21 = vpop.permute.xlu1 %1682 }
 0x25e   : > { %v1042_v22 = vsel %vm2599_vm8, %v1670_v7, %v1669_v25  ;;  %vm1434_vm12 = vmpackc.low %vm2600_vm11, %vm2600_vm11  ;;  %v1685_v0 = vunpack.i.h.bf16 %v1683_v21  ;;  %v1684_v5 = vunpack.i.l.bf16 %v1683_v21 }
 0x25f   : > { %v1435_v39 = vpack.c.bf16 %v1043_v34, %v1042_v22  ;;  %vm1437_vm15 = vmpackc.low %vm2601_vm3, %vm2601_vm3 }
 0x260   : > { %1415 = vmatpush1.bf16.msk.msra.mxu1 %vm1413_vm1, %v1414_v32  ;;  %vm2602_vm9 = vmmov %vm2597_vm6  ;;  %v1698_v14 = vpop.permute.xlu0 %1697 }
 0x261   : > { %1418 = vmatprep.subr.msk.bf16.mxu1 %vm1410_vm4, %v1417_v29  ;;  %v991_v28 = vsel %vm2602_vm9, %v1665_v47, %v1664_v31  ;;  %vm2387_vm5 = vmpackc.low %vm2603_vm2, %vm2603_vm2  ;;  %1436 = vmatprep.subr.msk.bf16.mxu0 %vm1434_vm12, %v1435_v39  ;;  %v1700_v18 = vunpack.i.h.bf16 %v1698_v14  ;;  %v1699_v20 = vunpack.i.l.bf16 %v1698_v14  ;;  %v1688_v45 = vpop.permute.xlu1 %1687 }
 0x262   : > { %vm2606_vm7 = vmmov %vm2597_vm6  ;;  %v1423_v62 = vpack.c.bf16 %v991_v28, %v990_v36  ;;  %1439 = vmatpush1.bf16.msk.msra.mxu0 %vm1437_vm15, %v1438_v40  ;;  %v1690_v10 = vunpack.i.h.bf16 %v1688_v45  ;;  %v1689_v16 = vunpack.i.l.bf16 %v1688_v45 }
 0x263   : > { %v974_v23 = vsel %vm2606_vm7, %v1654_v4, %v1655_v3  ;;  %vm2607_vm0 = vmmov %vm2597_vm6  ;;  %vm2610_vm6 = vcmp.le.s32.totalorder %v1932_v17, 14  ;;  %v1029_v51 = vsel %vm2599_vm8, %v1699_v20, %v1700_v18 }
 0x264   : > { %v993_v8 = vsel %vm2607_vm0, %v1695_v43, %v1694_v12  ;;  %vm2608_vm4 = vmmov %vm2607_vm0  ;;  %1421 = vmatpush1.bf16.msk.msra.mxu1 %vm1413_vm1, %v1420_v60 }
 0x265   : > { %v992_v44 = vsel %vm2608_vm4, %v1685_v0, %v1684_v5  ;;  %vm2609_vm14 = vmmov %vm2607_vm0  ;;  %1424 = vmatprep.subr.msk.bf16.mxu1 %vm2387_vm5, %v1423_v62 }
 0x266   : > { %v975_v19 = vsel %vm2609_vm14, %v1664_v31, %v1665_v47  ;;  %vm2415_vm13 = vmpackc.low %vm2610_vm6, %vm2610_vm6  ;;  %v1429_v50 = vpack.c.bf16 %v993_v8, %v992_v44 }
 0x267   : > { %v1426_v46 = vpack.c.bf16 %v975_v19, %v974_v23  ;;  %vm2613_vm10 = vmmov %vm2607_vm0 }
 0x268   : > { %v977_v49 = vsel %vm2613_vm10, %v1694_v12, %v1695_v43  ;;  %vm2614_vm1 = vmmov %vm2607_vm0  ;;  %vm1124_vm0 = vcmask 261120  }
 0x269   : > { %v976_v27 = vsel %vm2614_vm1, %v1684_v5, %v1685_v0  ;;  %vm2615_vm9 = vmmov %vm2599_vm8  ;;  %1427 = vmatpush1.bf16.msk.msra.mxu1 %vm2415_vm13, %v1426_v46 }
 0x26a   : > { %v1045_v24 = vsel %vm2615_vm9, %v1700_v18, %v1699_v20  ;;  %vm2616_vm2 = vmmov %vm2599_vm8  ;;  %1430 = vmatprep.subr.msk.bf16.mxu1 %vm2387_vm5, %v1429_v50  ;;  %v1432_v55 = vpack.c.bf16 %v977_v49, %v976_v27 }
 0x26b   : > { %v1028_v52 = vsel %vm2616_vm2, %v1689_v16, %v1690_v10  ;;  %vm2617_vm7 = vmmov %vm2616_vm2 }
 0x26c   : > { %v1044_v17 = vsel %vm2617_vm7, %v1690_v10, %v1689_v16  ;;  %v1444_v54 = vpack.c.bf16 %v1029_v51, %v1028_v52 }
 0x26d   : > { %v1441_v53 = vpack.c.bf16 %v1045_v24, %v1044_v17  ;;  %1433 = vmatpush1.bf16.msk.msra.mxu1 %vm2415_vm13, %v1432_v55 }
 0x26f   : > { %1442 = vmatprep.subr.msk.bf16.mxu0 %vm1434_vm12, %v1441_v53 }
 0x270   : > { %1445 = vmatpush1.bf16.msk.msra.mxu0 %vm1437_vm15, %v1444_v54  ;;  %1161 = vmatmul.mubr.bf16.vlgmr.msra.gmra.mrb[0].mxu1 %v2149_v41  ;;  %v1210_v41 = vmul.f32 1.0051794, %v1901_v2 }
 0x272   : > { %v1103_v56 = vpop.permute.xlu1 %1102 }
 0x273   : > { %1333 = vmatmul.mubr.msk.bf16.vlgmr.msra.gmra.mrb[8].mxu0 %vm1124_vm0, %v2152_v42 }
 0x343   : > { %v1162_v48 = vpop.f32.mrb[0].mxu1 }
 0x344   : > { %v1163_v57 = vadd.f32 %v1162_v48, %v1103_v56  ;;  %v1164_v59 = vpop.f32.mrb[1].mxu1 }
 0x345   : > { %v1165_v3 = vadd.f32 %v1164_v59, %v1103_v56  ;;  %v1166_v4 = vpop.f32.mrb[2].mxu1 }
 0x346   : > { %v1203_v33 = vpop.f32.mrb[8].mxu0  ;;  %v1167_v30 = vpop.f32.mrb[3].mxu1 }
 0x347   : > { %v1205_v61 = vpop.f32.mrb[9].mxu0  ;;  %v1204_v32 = vadd.f32 %v1203_v33, %v1163_v57 }
 0x348   : > { %v1207_v6 = vpop.f32.mrb[10].mxu0  ;;  %v1206_v63 = vadd.f32 %v1205_v61, %v1165_v3 }
 0x349   : > { %v1208_v47 = vpop.f32.mrb[11].mxu0  ;;  %v1211_v1 = vmul.f32 0.101909555, %v1204_v32 }
 0x34a   : > { %v1212_v9 = vmul.f32 0.101909555, %v1206_v63 }
 0x34c   : > { %v1215_v42 = vcombine.low %v1211_v1, %v1212_v9 }
 0x34e   : > { %v1217_v31 = vsub.f32 %v1210_v41, %v1215_v42 }
 0x350   : > { %v1334_v13 = vclamps-f32 %v1217_v31, 1.0 }
 0x352   : > { %v1220_v7 = vadd.f32 1.0, %v1334_v13 }
 0x354   : > { %v1221_v25 = vmul.f32 0.5, %v1220_v7 }
 0x356   : > { %1222 = vst [vmem:[%s218_s17] sm:$0xff] %v1221_v25 }
 0x357   : > { %1757 = shalt.err (!%p1754_p3)
}
 0x358   : > { %s1758_s10 = scalar_lea.hbm %s2449_s9, 128  ;;  %s1762_s13 = scalar_lea.hbm %s2496_s5, 256 }
 0x359   : > { %p1759_p4 = scmp.ne.s32.totalorder %s2449_s9, %s1758_s10  ;;  %p1763_p9 = scmp.lt.u32.totalorder %s2449_s9, %s2496_s5 }
 0x35a   : > { %p1764_p10 = scmp.lt.u32.totalorder %s1762_s13, %s1758_s10  ;;  %p1766_p12 = scmp.lt.u32.totalorder %s1758_s10, %s2449_s9 }
 0x35b   : > { %p1760_p7 = pnand %p1759_p4, %p1887_p5 }
 0x35c   : > { %p1765_p11 = por %p1764_p10, %p1763_p9 }
 0x35d   : > { %p1761_p8 = pneg %p1760_p7 }
 0x35e   : > { %p1767_p13 = por %p1766_p12, %p1765_p11 }
 0x360   : > { %p1768_p0 = pnand %p1767_p13, %p1761_p8 }
 0x362   : > { %1771 = shalt.err (!%p1768_p0)
}
 0x363   : > { %1450 = dma.vmem_to_hbm [thread:$0]  (%p1887_p5), %s2451_s6, 128, %s2449_s9, %s1224_s23  }
 0x364 PF: > { %p1456_p1 = scmp.ge.s32.totalorder %s1806_s21, 2  ;;  %s1250_s16 = sand.u32 1, %s1794_s18  }
 0x365   : > { %s1251_s17 = scalar_lea.sflag [#allocation5], %s1250_s16 }
 0x366   : > { %p1453_p2 = pnand %p1456_p1, %p1891_p6 }
 0x368   : > { %1789 = dma.done.wait (!%p1453_p2), %s1251_s17, 128  }
 0x369   : > { %1791 = vsyncadd (!%p1453_p2), %s1251_s17, 4294967168  ;;  %p15_p3 = scmp.ge.s32.totalorder %s1874_s24, 4   ;;  %s2618_s18 = smov %s1798_s19 }
 0x36a   : > { %s2619_s19 = smov %s1802_s20  ;;  %s2620_s20 = smov %s1885_s27 }
 0x36b   : > { %s2621_s21 = smov %s1874_s24  ;;  %17 = sbr.rel (!%p15_p3) target bundleno = 3 (0x3), region = 75 }
 0x372   :  { %1256 = vsyncpa [#allocation5], 1 }
 0x373   :  { %1258 = vsyncpa [#allocation5 + $0x1], 1 }

</bundles_post_ra>
